<compile_context>
chip_gen: v7x
topology: tpu7x:2x2x1
jax: 0.10.0
libtpu: 0.0.40
codegen_flags: <defaults>
</compile_context>

<pallas_src>
import functools

import numpy as np
import jax
import jax.numpy as jnp
from jax import lax
from jax.experimental import pallas as pl
from jax.experimental.pallas import tpu as pltpu

# ---------------- configuration (small synthetic shapes) ----------------
N = 2            # batch of point clouds
I = 16           # points per cloud
C = 4            # point dimensionality
P = 4            # augmentation channels
CP = C + P       # augmented channel width
K = 2            # number of k-means clusters per cloud
BRANCHING = 2    # upsampling branching factor
LEARNING_RATE = 1.0
KMEANS_ITERS = 8

_LANES = 128


# ---------- structural 0/1 selector matrices (numpy -> true compile-time constants) ----------

def _expand_cols(rows, period):
    # (rows, rows*period): M[r, m] = 1 iff m // period == r
    r = np.arange(rows)[:, None]
    c = np.arange(rows * period)[None, :]
    return (c // period == r).astype(np.float32)


def _collapse_rows(cols, period):
    # (cols*period, cols): M[m, c] = 1 iff m // period == c
    r = np.arange(cols * period)[:, None]
    c = np.arange(cols)[None, :]
    return (r // period == c).astype(np.float32)


def _sum_lanes(period, reps):
    # (period*reps, period): M[m, p] = 1 iff m % period == p
    r = np.arange(period * reps)[:, None]
    c = np.arange(period)[None, :]
    return (r % period == c).astype(np.float32)


def _rep_lanes(period, reps):
    # (period, period*reps): M[p, m] = 1 iff m % period == p
    r = np.arange(period)[:, None]
    c = np.arange(period * reps)[None, :]
    return (c % period == r).astype(np.float32)


def _eye_tiled(c_dim, cp, n_pts):
    # (c_dim*cp, n_pts*cp): M[m, m'] = 1 iff m % cp == m' % cp
    r = np.arange(c_dim * cp)[:, None]
    c = np.arange(n_pts * cp)[None, :]
    return (r % cp == c % cp).astype(np.float32)


def _pad_cols(c_dim, cp):
    # (c_dim, cp): zero-pad the P augmentation channels (identity in the first C columns)
    r = np.arange(c_dim)[:, None]
    c = np.arange(cp)[None, :]
    return (r == c).astype(np.float32)


# ---------- constant-slab packing (one lane-dense input instead of ~25 tiny ones) ----------

def _pack_constants(named):
    """Stack 2-D constants into one (rows, 128) f32 slab.

    Each entry is zero-padded to 128 lanes and its row block to a multiple of 8
    sublanes so every in-kernel static slice is tile-aligned.  Returns the slab
    plus a dict name -> (row_offset, rows, cols) of python ints.
    """
    offs = {}
    blocks = []
    row = 0
    for name, m in named:
        m = jnp.asarray(m, jnp.float32)
        h, w = m.shape
        assert w <= _LANES, (name, m.shape)
        hp = -(-h // 8) * 8
        blk = jnp.zeros((hp, _LANES), jnp.float32).at[:h, :w].set(m)
        offs[name] = (row, h, w)
        blocks.append(blk)
        row += hp
    return jnp.concatenate(blocks, axis=0), offs


# =========================== fused ExpandingLayer kernel ===========================

def _expanding_layer_kernel(x_ref, cst_ref, feat_out_ref, ups_out_ref, *,
                            offs, n_pts, c_dim, p_aug, n_clusters, lr, kmeans_iters):
    f32 = jnp.float32
    cp = c_dim + p_aug

    def cst(name):
        r0, h, w = offs[name]
        return cst_ref[r0:r0 + h, 0:w]        # static slice of the packed constant slab

    x = x_ref[...]                            # (I, C)

    # ---------------- 1) SelfCorrelation: feat = x + lr * mlp(x) ----------------
    # TODO(synk): SelfCorrelation source not provided; residual-MLP semantics assumed.
    feat = x + lr * (jnp.dot(x, cst("mw"), preferred_element_type=f32) + cst("mb"))   # (I, C)
    # featT = feat^T via the MXU (eye_C @ feat^T) -- the A@B^T dot_general pattern,
    # avoids a standalone relayout-transpose and any duplicated transposed-input path.
    featT = lax.dot_general(cst("eye_c"), feat, (((1,), (1,)), ((), ())),
                            preferred_element_type=f32)                               # (C, I)

    # ---------------- 2a) per-cloud Lloyd k-means (first-K init), fully unrolled --------
    # TODO(synk): reference implies sklearn-style kmeans (kmeansInit, n_init restarts);
    #             replaced by a fixed-iteration Lloyd inside the kernel.
    kiota = lax.broadcasted_iota(jnp.int32, (n_pts, n_clusters), 1)
    xsq = jnp.sum(feat * feat, axis=1, keepdims=True)                     # (I, 1)

    def assign_onehot(ct):                                                # ct: (C, K)
        csq = jnp.sum(ct * ct, axis=0, keepdims=True)                     # (1, K)
        d = xsq - 2.0 * jnp.dot(feat, ct, preferred_element_type=f32) + csq
        dmin = jnp.min(d, axis=1, keepdims=True)
        cand = jnp.where(d <= dmin, kiota, n_clusters)
        lab = jnp.min(cand, axis=1, keepdims=True)                        # first argmin
        return (kiota == lab).astype(f32)                                 # (I, K)

    def lloyd(_, ct):
        oh_it = assign_onehot(ct)
        cnt = jnp.sum(oh_it, axis=0, keepdims=True)                       # (1, K)
        sums = jnp.dot(featT, oh_it, preferred_element_type=f32)          # (C, K)
        return jnp.where(cnt > 0.5, sums / jnp.maximum(cnt, 1.0), ct)

    ct = lax.fori_loop(0, kmeans_iters, lloyd, featT[:, :n_clusters], unroll=True)
    oh = assign_onehot(ct)                                                # (I, K)
    same_cluster = lax.dot_general(oh, oh, (((1,), (1,)), ((), ())),
                                   preferred_element_type=f32)            # (I, I)

    # ---------------- 2b) intra-cluster graph convolution (vectorized, lane-dense) ------
    # TODO(synk): KMeansConv source not provided; construction follows its docstring.
    t_f = jnp.dot(feat, cst("fw"), preferred_element_type=f32) + cst("fb")   # (I, C*CP)
    t_w = jnp.dot(feat, cst("ww"), preferred_element_type=f32) + cst("wb")   # (I, C*CP)

    # self term: self_t[i, p] = sum_c feat[i, c] * W_i[c, p]
    feat_rep = jnp.dot(feat, cst("rep_c"), preferred_element_type=f32)       # (I, C*CP)
    self_t = jnp.dot(feat_rep * t_w, cst("sum_c"), preferred_element_type=f32)   # (I, CP)
    self_b = jnp.dot(self_t, cst("rep_p"), preferred_element_type=f32)       # (I, I*CP)

    # neighbour term: neigh[i, j*CP+p] = sum_c feat[j, c] * F_i[c, p]
    featT_up = jnp.dot(jnp.dot(cst("red_c"), featT, preferred_element_type=f32),
                       cst("exp_i"), preferred_element_type=f32)             # (C*CP, I*CP)
    g = featT_up * cst("eye_til")                                            # kron(feat^T, I_CP)
    neigh = jnp.dot(t_f, g, preferred_element_type=f32)                      # (I, I*CP)

    pre = neigh + self_b
    msg = jnp.dot(pre, cst("sigma_bd"), preferred_element_type=f32) + cst("sigma_bt")  # (I, I*CP)

    # attention scores + masked softmax over neighbours j (lane axis)
    scores = jnp.dot(msg, cst("m_bd"), preferred_element_type=f32) + cst("m_bias")     # (I, I)
    scores = jnp.where(same_cluster > 0.5, scores, -1e30)
    smax = jnp.max(scores, axis=1, keepdims=True)
    ex = jnp.where(same_cluster > 0.5, jnp.exp(scores - smax), 0.0)
    att = ex * pl.reciprocal(jnp.sum(ex, axis=1, keepdims=True), approx=True)          # (I, I)

    att_exp = jnp.dot(att, cst("exp_i"), preferred_element_type=f32)                   # (I, I*CP)
    agg = jnp.dot(att_exp * msg, cst("sum_i"), preferred_element_type=f32)             # (I, CP)
    conv_feat = jnp.dot(agg, cst("bw"), preferred_element_type=f32) + cst("bb")        # (I, CP)

    # augmented features (C -> C+P, zero padding of the P augmentation channels)
    feat_aug = jnp.dot(feat, cst("pad_c"), preferred_element_type=f32)                 # (I, CP)

    # ---------------- 3) LocalAdaptiveFeatureAggregation ----------------
    # TODO(synk): source not provided; softmax-gated two-stream fusion assumed.
    a1 = jnp.dot(feat_aug, cst("w1"), preferred_element_type=f32) + cst("b1")
    a2 = jnp.dot(conv_feat, cst("w2"), preferred_element_type=f32) + cst("b2")
    mx = jnp.maximum(a1, a2)
    e1 = jnp.exp(a1 - mx)
    e2 = jnp.exp(a2 - mx)
    feat2 = (e1 * feat_aug + e2 * conv_feat) * pl.reciprocal(e1 + e2, approx=True)     # (I, CP)

    # ---------------- 4) GraphMaxPool: one 2-D masked max, no per-cluster loop ----------
    # TODO(synk): GraphMaxPool source not provided; segmented max assumed.
    oh_exp = jnp.dot(oh, cst("exp_k"), preferred_element_type=f32)           # (I, K*CP)
    feat2_rep = jnp.dot(feat2, cst("rep_kp"), preferred_element_type=f32)    # (I, K*CP)
    masked = jnp.where(oh_exp > 0.5, feat2_rep, -1e30)
    pooled = jnp.max(masked, axis=0, keepdims=True)                          # (1, K*CP)
    cnt = jnp.sum(oh_exp, axis=0, keepdims=True)                             # (1, K*CP)
    pooled = jnp.where(cnt > 0.5, pooled, 0.0)

    # ---------------- 5) UpSampling mlp3, block-diagonal over the K clusters -----------
    ups = jnp.dot(pooled, cst("uw_bd"), preferred_element_type=f32) + cst("ub_t")  # (1, K*CP*BR)

    # ---------------- 6) whole-block stores (row reshuffle + concat done in wrapper) ----
    feat_out_ref[...] = feat2
    ups_out_ref[...] = ups


# =========================== pallas_call wrapper ===========================

def expanding_layer_forward(x, params):
    n, i, c = x.shape
    cp = c + P
    kbr = K * BRANCHING

    mw, mb = params["mlp"]
    sw, sb = params["sigma"]
    fw, fb = params["F"]
    ww, wb = params["W"]
    mww, mwb = params["M"]
    bw, bb = params["B"]
    w1, b1 = params["mlp1"]
    w2, b2 = params["mlp2"]
    uw, ub = params["mlp3"]

    # one-time, parameter-only layout transforms (tiny XLA ops outside the kernel)
    eye_i = jnp.eye(i, dtype=jnp.float32)
    eye_k = jnp.eye(K, dtype=jnp.float32)
    sigma_bd = jnp.kron(eye_i, sw)                   # (I*CP, I*CP)
    sigma_bt = jnp.tile(sb, (1, i))                  # (1, I*CP)
    m_bd = jnp.kron(eye_i, mww)                      # (I*CP, I)
    uw_bd = jnp.kron(eye_k, uw)                      # (K*CP, K*CP*BR)
    ub_t = jnp.tile(ub, (1, K))                      # (1, K*CP*BR)

    consts = [
        ("mw", mw), ("mb", mb),
        ("fw", fw), ("fb", fb), ("ww", ww), ("wb", wb),
        ("sigma_bd", sigma_bd), ("sigma_bt", sigma_bt),
        ("m_bd", m_bd), ("m_bias", mwb),
        ("bw", bw), ("bb", bb),
        ("w1", w1), ("b1", b1), ("w2", w2), ("b2", b2),
        ("uw_bd", uw_bd), ("ub_t", ub_t),
        # structural selectors (pure constants, hoisted out of the kernel)
        ("eye_c", np.eye(c, dtype=np.float32)),
        ("rep_c", _expand_cols(c, cp)),
        ("exp_i", _expand_cols(i, cp)),
        ("red_c", _collapse_rows(c, cp)),
        ("sum_c", _sum_lanes(cp, c)),
        ("sum_i", _sum_lanes(cp, i)),
        ("rep_p", _rep_lanes(cp, i)),
        ("eye_til", _eye_tiled(c, cp, i)),
        ("pad_c", _pad_cols(c, cp)),
        ("exp_k", _expand_cols(K, cp)),
        ("rep_kp", _rep_lanes(cp, K)),
    ]
    slab, offs = _pack_constants(consts)             # one lane-dense constant input
    slab_rows = slab.shape[0]

    kernel = functools.partial(
        _expanding_layer_kernel,
        offs=offs, n_pts=i, c_dim=c, p_aug=P, n_clusters=K,
        lr=LEARNING_RATE, kmeans_iters=KMEANS_ITERS)

    feat2, ups = pl.pallas_call(
        kernel,
        grid=(n,),
        in_specs=[
            pl.BlockSpec((None, i, c), lambda b: (b, 0, 0)),                # x: one cloud / step
            pl.BlockSpec((slab_rows, _LANES), lambda b: (0, 0)),             # packed constants
        ],
        out_specs=[
            pl.BlockSpec((None, i, cp), lambda b: (b, 0, 0)),                # feat2
            pl.BlockSpec((None, 1, K * cp * BRANCHING), lambda b: (b, 0, 0)),  # ups (lane-dense)
        ],
        out_shape=(
            jax.ShapeDtypeStruct((n, i, cp), jnp.float32),
            jax.ShapeDtypeStruct((n, 1, K * cp * BRANCHING), jnp.float32),
        ),
        compiler_params=pltpu.CompilerParams(dimension_semantics=("parallel",)),
    )(x, slab)

    # UpSampling's view(N, -1, D): (N, 1, K*CP*BR) -> (N, K*BR, CP); concat along points.
    ups = ups.reshape(n, kbr, cp)
    return jnp.concatenate([feat2, ups], axis=1)     # (N, I + K*BR, CP)


# =========================== parameters & main ===========================

def make_linear(key, din, dout, scale=0.2):
    kw, kb = jax.random.split(key)
    w = jax.random.normal(kw, (din, dout), jnp.float32) * scale
    b = jax.random.normal(kb, (1, dout), jnp.float32) * scale
    return w, b


if __name__ == "__main__":
    keys = jax.random.split(jax.random.PRNGKey(0), 10)
    params = {
        "mlp":   make_linear(keys[0], C, C),                 # R^C   -> R^C
        "sigma": make_linear(keys[1], CP, CP),               # R^CP  -> R^CP
        "F":     make_linear(keys[2], C, C * CP),            # R^C   -> R^(C x CP)
        "W":     make_linear(keys[3], C, C * CP),            # R^C   -> R^(C x CP)
        "M":     make_linear(keys[4], CP, 1),                # R^CP  -> R
        "B":     make_linear(keys[5], CP, CP),               # R^CP  -> R^CP
        "mlp1":  make_linear(keys[6], CP, CP),                # R^CP  -> R^CP
        "mlp2":  make_linear(keys[7], CP, CP),                # R^CP  -> R^CP
        "mlp3":  make_linear(keys[8], CP, CP * BRANCHING),    # R^CP  -> R^(CP*branching)
    }
    x = jax.random.normal(keys[9], (N, I, C), jnp.float32)

    fwd = jax.jit(expanding_layer_forward)
    out = fwd(x, params)
    jax.block_until_ready(out)

    assert out.shape == (N, I + K * BRANCHING, CP), out.shape
    assert bool(jnp.all(jnp.isfinite(out)))
    print("KERNEL_OK")
</pallas_src>

<mosaic_0001>
module attributes {stable_mosaic.version = 11 : i64} {
  func.func @_expanding_layer_kernel(%arg0: i32, %arg1: memref<1x16x4xf32, #tpu.memory_space<vmem>>, %arg2: memref<680x128xf32, #tpu.memory_space<vmem>>, %arg3: memref<1x16x8xf32, #tpu.memory_space<vmem>>, %arg4: memref<1x1x32xf32, #tpu.memory_space<vmem>>) attributes {dimension_semantics = [#tpu.dimension_semantics<parallel>], iteration_bounds = array<i64: 2>, scalar_prefetch = 0 : i64, scratch_operands = 0 : i64, tpu.core_type = #tpu.core_type<tc>, window_params = [{transform_indices = @transform_0, window_bounds = array<i64: 1, 16, 4>}, {pipeline_mode = #tpu.pipeline_mode<synchronous>, transform_indices = @transform_1, window_bounds = array<i64: 680, 128>}, {transform_indices = @transform_2, window_bounds = array<i64: 1, 16, 8>}, {transform_indices = @transform_3, window_bounds = array<i64: 1, 1, 32>}]} {
    %c0 = arith.constant 0 : index
    %c0_0 = arith.constant 0 : index
    %c0_1 = arith.constant 0 : index
    %0 = vector.load %arg1[%c0, %c0_0, %c0_1] : memref<1x16x4xf32, #tpu.memory_space<vmem>>, vector<1x16x4xf32>
    %1 = vector.shape_cast %0 : vector<1x16x4xf32> to vector<16x4xf32>
    %c0_2 = arith.constant 0 : index
    %c0_3 = arith.constant 0 : index
    %2 = vector.load %arg2[%c0_2, %c0_3] : memref<680x128xf32, #tpu.memory_space<vmem>>, vector<4x4xf32>
    %cst = arith.constant dense<0.000000e+00> : vector<16x4xf32>
    %3 = tpu.matmul %1, %2, %cst {dimension_numbers = #tpu.dot_dimension_numbers<[1], [0], [0], [1], [0, 0, 1, 1], [], []>} : vector<16x4xf32>, vector<4x4xf32>, vector<16x4xf32> -> vector<16x4xf32>
    %c8 = arith.constant 8 : index
    %c0_4 = arith.constant 0 : index
    %4 = vector.load %arg2[%c8, %c0_4] : memref<680x128xf32, #tpu.memory_space<vmem>>, vector<1x4xf32>
    %5 = vector.broadcast %4 : vector<1x4xf32> to vector<16x4xf32>
    %6 = arith.addf %3, %5 : vector<16x4xf32>
    %cst_5 = arith.constant 1.000000e+00 : f32
    %7 = vector.broadcast %cst_5 : f32 to vector<16x4xf32>
    %8 = arith.mulf %7, %6 : vector<16x4xf32>
    %9 = arith.addf %1, %8 : vector<16x4xf32>
    %c392 = arith.constant 392 : index
    %c0_6 = arith.constant 0 : index
    %10 = vector.load %arg2[%c392, %c0_6] : memref<680x128xf32, #tpu.memory_space<vmem>>, vector<4x4xf32>
    %cst_7 = arith.constant dense<0.000000e+00> : vector<4x16xf32>
    %11 = tpu.matmul %10, %9, %cst_7 {dimension_numbers = #tpu.dot_dimension_numbers<[1], [1], [0], [0], [0, 0, 1, 0], [], []>} : vector<4x4xf32>, vector<16x4xf32>, vector<4x16xf32> -> vector<4x16xf32>
    %12 = tpu.iota {dimensions = array<i32: 1>} : vector<16x2xi32>
    %13 = arith.mulf %9, %9 : vector<16x4xf32>
    %cst_8 = arith.constant dense<0.000000e+00> : vector<16xf32>
    %14 = vector.multi_reduction <add>, %13, %cst_8 [1] : vector<16x4xf32> to vector<16xf32>
    %15 = vector.shape_cast %14 : vector<16xf32> to vector<16x1xf32>
    %16 = vector.extract_strided_slice %11 {offsets = [0, 0], sizes = [4, 2], strides = [1, 1]} : vector<4x16xf32> to vector<4x2xf32>
    %c0_i32 = arith.constant 0 : i32
    %17 = arith.mulf %16, %16 : vector<4x2xf32>
    %cst_9 = arith.constant dense<0.000000e+00> : vector<2xf32>
    %18 = vector.multi_reduction <add>, %17, %cst_9 [0] : vector<4x2xf32> to vector<2xf32>
    %19 = vector.shape_cast %18 : vector<2xf32> to vector<1x2xf32>
    %cst_10 = arith.constant dense<0.000000e+00> : vector<16x2xf32>
    %20 = tpu.matmul %9, %16, %cst_10 {dimension_numbers = #tpu.dot_dimension_numbers<[1], [0], [0], [1], [0, 0, 1, 1], [], []>} : vector<16x4xf32>, vector<4x2xf32>, vector<16x2xf32> -> vector<16x2xf32>
    %cst_11 = arith.constant 2.000000e+00 : f32
    %21 = vector.broadcast %cst_11 : f32 to vector<16x2xf32>
    %22 = arith.mulf %21, %20 : vector<16x2xf32>
    %23 = vector.broadcast %15 : vector<16x1xf32> to vector<16x2xf32>
    %24 = arith.subf %23, %22 : vector<16x2xf32>
    %25 = vector.broadcast %19 : vector<1x2xf32> to vector<16x2xf32>
    %26 = arith.addf %24, %25 : vector<16x2xf32>
    %cst_12 = arith.constant dense<0x7F800000> : vector<16xf32>
    %27 = vector.multi_reduction <minimumf>, %26, %cst_12 [1] : vector<16x2xf32> to vector<16xf32>
    %28 = vector.shape_cast %27 : vector<16xf32> to vector<16x1xf32>
    %29 = vector.broadcast %28 : vector<16x1xf32> to vector<16x2xf32>
    %30 = arith.cmpf ole, %26, %29 : vector<16x2xf32>
    %c2_i32 = arith.constant 2 : i32
    %31 = vector.broadcast %c2_i32 : i32 to vector<16x2xi32>
    %32 = arith.select %30, %12, %31 : vector<16x2xi1>, vector<16x2xi32>
    %cst_13 = arith.constant dense<2147483647> : vector<16xi32>
    %33 = vector.multi_reduction <minsi>, %32, %cst_13 [1] : vector<16x2xi32> to vector<16xi32>
    %34 = vector.shape_cast %33 : vector<16xi32> to vector<16x1xi32>
    %35 = vector.broadcast %34 : vector<16x1xi32> to vector<16x2xi32>
    %36 = arith.cmpi eq, %12, %35 : vector<16x2xi32>
    %37 = arith.extui %36 : vector<16x2xi1> to vector<16x2xi32>
    %38 = arith.sitofp %37 : vector<16x2xi32> to vector<16x2xf32>
    %cst_14 = arith.constant dense<0.000000e+00> : vector<2xf32>
    %39 = vector.multi_reduction <add>, %38, %cst_14 [0] : vector<16x2xf32> to vector<2xf32>
    %40 = vector.shape_cast %39 : vector<2xf32> to vector<1x2xf32>
    %cst_15 = arith.constant dense<0.000000e+00> : vector<4x2xf32>
    %41 = tpu.matmul %11, %38, %cst_15 {dimension_numbers = #tpu.dot_dimension_numbers<[1], [0], [0], [1], [0, 0, 1, 1], [], []>} : vector<4x16xf32>, vector<16x2xf32>, vector<4x2xf32> -> vector<4x2xf32>
    %cst_16 = arith.constant 5.000000e-01 : f32
    %42 = vector.broadcast %cst_16 : f32 to vector<1x2xf32>
    %43 = arith.cmpf ogt, %40, %42 : vector<1x2xf32>
    %cst_17 = arith.constant 1.000000e+00 : f32
    %44 = vector.broadcast %cst_17 : f32 to vector<1x2xf32>
    %45 = arith.maximumf %40, %44 : vector<1x2xf32>
    %46 = vector.broadcast %45 : vector<1x2xf32> to vector<4x2xf32>
    %47 = arith.divf %41, %46 : vector<4x2xf32>
    %48 = vector.shape_cast %43 : vector<1x2xi1> to vector<1x2xi1>
    %49 = vector.broadcast %48 : vector<1x2xi1> to vector<4x2xi1>
    %50 = arith.select %49, %47, %16 : vector<4x2xi1>, vector<4x2xf32>
    %c1_i32 = arith.constant 1 : i32
    %51 = arith.mulf %50, %50 : vector<4x2xf32>
    %cst_18 = arith.constant dense<0.000000e+00> : vector<2xf32>
    %52 = vector.multi_reduction <add>, %51, %cst_18 [0] : vector<4x2xf32> to vector<2xf32>
    %53 = vector.shape_cast %52 : vector<2xf32> to vector<1x2xf32>
    %cst_19 = arith.constant dense<0.000000e+00> : vector<16x2xf32>
    %54 = tpu.matmul %9, %50, %cst_19 {dimension_numbers = #tpu.dot_dimension_numbers<[1], [0], [0], [1], [0, 0, 1, 1], [], []>} : vector<16x4xf32>, vector<4x2xf32>, vector<16x2xf32> -> vector<16x2xf32>
    %cst_20 = arith.constant 2.000000e+00 : f32
    %55 = vector.broadcast %cst_20 : f32 to vector<16x2xf32>
    %56 = arith.mulf %55, %54 : vector<16x2xf32>
    %57 = vector.broadcast %15 : vector<16x1xf32> to vector<16x2xf32>
    %58 = arith.subf %57, %56 : vector<16x2xf32>
    %59 = vector.broadcast %53 : vector<1x2xf32> to vector<16x2xf32>
    %60 = arith.addf %58, %59 : vector<16x2xf32>
    %cst_21 = arith.constant dense<0x7F800000> : vector<16xf32>
    %61 = vector.multi_reduction <minimumf>, %60, %cst_21 [1] : vector<16x2xf32> to vector<16xf32>
    %62 = vector.shape_cast %61 : vector<16xf32> to vector<16x1xf32>
    %63 = vector.broadcast %62 : vector<16x1xf32> to vector<16x2xf32>
    %64 = arith.cmpf ole, %60, %63 : vector<16x2xf32>
    %c2_i32_22 = arith.constant 2 : i32
    %65 = vector.broadcast %c2_i32_22 : i32 to vector<16x2xi32>
    %66 = arith.select %64, %12, %65 : vector<16x2xi1>, vector<16x2xi32>
    %cst_23 = arith.constant dense<2147483647> : vector<16xi32>
    %67 = vector.multi_reduction <minsi>, %66, %cst_23 [1] : vector<16x2xi32> to vector<16xi32>
    %68 = vector.shape_cast %67 : vector<16xi32> to vector<16x1xi32>
    %69 = vector.broadcast %68 : vector<16x1xi32> to vector<16x2xi32>
    %70 = arith.cmpi eq, %12, %69 : vector<16x2xi32>
    %71 = arith.extui %70 : vector<16x2xi1> to vector<16x2xi32>
    %72 = arith.sitofp %71 : vector<16x2xi32> to vector<16x2xf32>
    %cst_24 = arith.constant dense<0.000000e+00> : vector<2xf32>
    %73 = vector.multi_reduction <add>, %72, %cst_24 [0] : vector<16x2xf32> to vector<2xf32>
    %74 = vector.shape_cast %73 : vector<2xf32> to vector<1x2xf32>
    %cst_25 = arith.constant dense<0.000000e+00> : vector<4x2xf32>
    %75 = tpu.matmul %11, %72, %cst_25 {dimension_numbers = #tpu.dot_dimension_numbers<[1], [0], [0], [1], [0, 0, 1, 1], [], []>} : vector<4x16xf32>, vector<16x2xf32>, vector<4x2xf32> -> vector<4x2xf32>
    %cst_26 = arith.constant 5.000000e-01 : f32
    %76 = vector.broadcast %cst_26 : f32 to vector<1x2xf32>
    %77 = arith.cmpf ogt, %74, %76 : vector<1x2xf32>
    %cst_27 = arith.constant 1.000000e+00 : f32
    %78 = vector.broadcast %cst_27 : f32 to vector<1x2xf32>
    %79 = arith.maximumf %74, %78 : vector<1x2xf32>
    %80 = vector.broadcast %79 : vector<1x2xf32> to vector<4x2xf32>
    %81 = arith.divf %75, %80 : vector<4x2xf32>
    %82 = vector.shape_cast %77 : vector<1x2xi1> to vector<1x2xi1>
    %83 = vector.broadcast %82 : vector<1x2xi1> to vector<4x2xi1>
    %84 = arith.select %83, %81, %50 : vector<4x2xi1>, vector<4x2xf32>
    %c2_i32_28 = arith.constant 2 : i32
    %85 = arith.mulf %84, %84 : vector<4x2xf32>
    %cst_29 = arith.constant dense<0.000000e+00> : vector<2xf32>
    %86 = vector.multi_reduction <add>, %85, %cst_29 [0] : vector<4x2xf32> to vector<2xf32>
    %87 = vector.shape_cast %86 : vector<2xf32> to vector<1x2xf32>
    %cst_30 = arith.constant dense<0.000000e+00> : vector<16x2xf32>
    %88 = tpu.matmul %9, %84, %cst_30 {dimension_numbers = #tpu.dot_dimension_numbers<[1], [0], [0], [1], [0, 0, 1, 1], [], []>} : vector<16x4xf32>, vector<4x2xf32>, vector<16x2xf32> -> vector<16x2xf32>
    %cst_31 = arith.constant 2.000000e+00 : f32
    %89 = vector.broadcast %cst_31 : f32 to vector<16x2xf32>
    %90 = arith.mulf %89, %88 : vector<16x2xf32>
    %91 = vector.broadcast %15 : vector<16x1xf32> to vector<16x2xf32>
    %92 = arith.subf %91, %90 : vector<16x2xf32>
    %93 = vector.broadcast %87 : vector<1x2xf32> to vector<16x2xf32>
    %94 = arith.addf %92, %93 : vector<16x2xf32>
    %cst_32 = arith.constant dense<0x7F800000> : vector<16xf32>
    %95 = vector.multi_reduction <minimumf>, %94, %cst_32 [1] : vector<16x2xf32> to vector<16xf32>
    %96 = vector.shape_cast %95 : vector<16xf32> to vector<16x1xf32>
    %97 = vector.broadcast %96 : vector<16x1xf32> to vector<16x2xf32>
    %98 = arith.cmpf ole, %94, %97 : vector<16x2xf32>
    %c2_i32_33 = arith.constant 2 : i32
    %99 = vector.broadcast %c2_i32_33 : i32 to vector<16x2xi32>
    %100 = arith.select %98, %12, %99 : vector<16x2xi1>, vector<16x2xi32>
    %cst_34 = arith.constant dense<2147483647> : vector<16xi32>
    %101 = vector.multi_reduction <minsi>, %100, %cst_34 [1] : vector<16x2xi32> to vector<16xi32>
    %102 = vector.shape_cast %101 : vector<16xi32> to vector<16x1xi32>
    %103 = vector.broadcast %102 : vector<16x1xi32> to vector<16x2xi32>
    %104 = arith.cmpi eq, %12, %103 : vector<16x2xi32>
    %105 = arith.extui %104 : vector<16x2xi1> to vector<16x2xi32>
    %106 = arith.sitofp %105 : vector<16x2xi32> to vector<16x2xf32>
    %cst_35 = arith.constant dense<0.000000e+00> : vector<2xf32>
    %107 = vector.multi_reduction <add>, %106, %cst_35 [0] : vector<16x2xf32> to vector<2xf32>
    %108 = vector.shape_cast %107 : vector<2xf32> to vector<1x2xf32>
    %cst_36 = arith.constant dense<0.000000e+00> : vector<4x2xf32>
    %109 = tpu.matmul %11, %106, %cst_36 {dimension_numbers = #tpu.dot_dimension_numbers<[1], [0], [0], [1], [0, 0, 1, 1], [], []>} : vector<4x16xf32>, vector<16x2xf32>, vector<4x2xf32> -> vector<4x2xf32>
    %cst_37 = arith.constant 5.000000e-01 : f32
    %110 = vector.broadcast %cst_37 : f32 to vector<1x2xf32>
    %111 = arith.cmpf ogt, %108, %110 : vector<1x2xf32>
    %cst_38 = arith.constant 1.000000e+00 : f32
    %112 = vector.broadcast %cst_38 : f32 to vector<1x2xf32>
    %113 = arith.maximumf %108, %112 : vector<1x2xf32>
    %114 = vector.broadcast %113 : vector<1x2xf32> to vector<4x2xf32>
    %115 = arith.divf %109, %114 : vector<4x2xf32>
    %116 = vector.shape_cast %111 : vector<1x2xi1> to vector<1x2xi1>
    %117 = vector.broadcast %116 : vector<1x2xi1> to vector<4x2xi1>
    %118 = arith.select %117, %115, %84 : vector<4x2xi1>, vector<4x2xf32>
    %c3_i32 = arith.constant 3 : i32
    %119 = arith.mulf %118, %118 : vector<4x2xf32>
    %cst_39 = arith.constant dense<0.000000e+00> : vector<2xf32>
    %120 = vector.multi_reduction <add>, %119, %cst_39 [0] : vector<4x2xf32> to vector<2xf32>
    %121 = vector.shape_cast %120 : vector<2xf32> to vector<1x2xf32>
    %cst_40 = arith.constant dense<0.000000e+00> : vector<16x2xf32>
    %122 = tpu.matmul %9, %118, %cst_40 {dimension_numbers = #tpu.dot_dimension_numbers<[1], [0], [0], [1], [0, 0, 1, 1], [], []>} : vector<16x4xf32>, vector<4x2xf32>, vector<16x2xf32> -> vector<16x2xf32>
    %cst_41 = arith.constant 2.000000e+00 : f32
    %123 = vector.broadcast %cst_41 : f32 to vector<16x2xf32>
    %124 = arith.mulf %123, %122 : vector<16x2xf32>
    %125 = vector.broadcast %15 : vector<16x1xf32> to vector<16x2xf32>
    %126 = arith.subf %125, %124 : vector<16x2xf32>
    %127 = vector.broadcast %121 : vector<1x2xf32> to vector<16x2xf32>
    %128 = arith.addf %126, %127 : vector<16x2xf32>
    %cst_42 = arith.constant dense<0x7F800000> : vector<16xf32>
    %129 = vector.multi_reduction <minimumf>, %128, %cst_42 [1] : vector<16x2xf32> to vector<16xf32>
    %130 = vector.shape_cast %129 : vector<16xf32> to vector<16x1xf32>
    %131 = vector.broadcast %130 : vector<16x1xf32> to vector<16x2xf32>
    %132 = arith.cmpf ole, %128, %131 : vector<16x2xf32>
    %c2_i32_43 = arith.constant 2 : i32
    %133 = vector.broadcast %c2_i32_43 : i32 to vector<16x2xi32>
    %134 = arith.select %132, %12, %133 : vector<16x2xi1>, vector<16x2xi32>
    %cst_44 = arith.constant dense<2147483647> : vector<16xi32>
    %135 = vector.multi_reduction <minsi>, %134, %cst_44 [1] : vector<16x2xi32> to vector<16xi32>
    %136 = vector.shape_cast %135 : vector<16xi32> to vector<16x1xi32>
    %137 = vector.broadcast %136 : vector<16x1xi32> to vector<16x2xi32>
    %138 = arith.cmpi eq, %12, %137 : vector<16x2xi32>
    %139 = arith.extui %138 : vector<16x2xi1> to vector<16x2xi32>
    %140 = arith.sitofp %139 : vector<16x2xi32> to vector<16x2xf32>
    %cst_45 = arith.constant dense<0.000000e+00> : vector<2xf32>
    %141 = vector.multi_reduction <add>, %140, %cst_45 [0] : vector<16x2xf32> to vector<2xf32>
    %142 = vector.shape_cast %141 : vector<2xf32> to vector<1x2xf32>
    %cst_46 = arith.constant dense<0.000000e+00> : vector<4x2xf32>
    %143 = tpu.matmul %11, %140, %cst_46 {dimension_numbers = #tpu.dot_dimension_numbers<[1], [0], [0], [1], [0, 0, 1, 1], [], []>} : vector<4x16xf32>, vector<16x2xf32>, vector<4x2xf32> -> vector<4x2xf32>
    %cst_47 = arith.constant 5.000000e-01 : f32
    %144 = vector.broadcast %cst_47 : f32 to vector<1x2xf32>
    %145 = arith.cmpf ogt, %142, %144 : vector<1x2xf32>
    %cst_48 = arith.constant 1.000000e+00 : f32
    %146 = vector.broadcast %cst_48 : f32 to vector<1x2xf32>
    %147 = arith.maximumf %142, %146 : vector<1x2xf32>
    %148 = vector.broadcast %147 : vector<1x2xf32> to vector<4x2xf32>
    %149 = arith.divf %143, %148 : vector<4x2xf32>
    %150 = vector.shape_cast %145 : vector<1x2xi1> to vector<1x2xi1>
    %151 = vector.broadcast %150 : vector<1x2xi1> to vector<4x2xi1>
    %152 = arith.select %151, %149, %118 : vector<4x2xi1>, vector<4x2xf32>
    %c4_i32 = arith.constant 4 : i32
    %153 = arith.mulf %152, %152 : vector<4x2xf32>
    %cst_49 = arith.constant dense<0.000000e+00> : vector<2xf32>
    %154 = vector.multi_reduction <add>, %153, %cst_49 [0] : vector<4x2xf32> to vector<2xf32>
    %155 = vector.shape_cast %154 : vector<2xf32> to vector<1x2xf32>
    %cst_50 = arith.constant dense<0.000000e+00> : vector<16x2xf32>
    %156 = tpu.matmul %9, %152, %cst_50 {dimension_numbers = #tpu.dot_dimension_numbers<[1], [0], [0], [1], [0, 0, 1, 1], [], []>} : vector<16x4xf32>, vector<4x2xf32>, vector<16x2xf32> -> vector<16x2xf32>
    %cst_51 = arith.constant 2.000000e+00 : f32
    %157 = vector.broadcast %cst_51 : f32 to vector<16x2xf32>
    %158 = arith.mulf %157, %156 : vector<16x2xf32>
    %159 = vector.broadcast %15 : vector<16x1xf32> to vector<16x2xf32>
    %160 = arith.subf %159, %158 : vector<16x2xf32>
    %161 = vector.broadcast %155 : vector<1x2xf32> to vector<16x2xf32>
    %162 = arith.addf %160, %161 : vector<16x2xf32>
    %cst_52 = arith.constant dense<0x7F800000> : vector<16xf32>
    %163 = vector.multi_reduction <minimumf>, %162, %cst_52 [1] : vector<16x2xf32> to vector<16xf32>
    %164 = vector.shape_cast %163 : vector<16xf32> to vector<16x1xf32>
    %165 = vector.broadcast %164 : vector<16x1xf32> to vector<16x2xf32>
    %166 = arith.cmpf ole, %162, %165 : vector<16x2xf32>
    %c2_i32_53 = arith.constant 2 : i32
    %167 = vector.broadcast %c2_i32_53 : i32 to vector<16x2xi32>
    %168 = arith.select %166, %12, %167 : vector<16x2xi1>, vector<16x2xi32>
    %cst_54 = arith.constant dense<2147483647> : vector<16xi32>
    %169 = vector.multi_reduction <minsi>, %168, %cst_54 [1] : vector<16x2xi32> to vector<16xi32>
    %170 = vector.shape_cast %169 : vector<16xi32> to vector<16x1xi32>
    %171 = vector.broadcast %170 : vector<16x1xi32> to vector<16x2xi32>
    %172 = arith.cmpi eq, %12, %171 : vector<16x2xi32>
    %173 = arith.extui %172 : vector<16x2xi1> to vector<16x2xi32>
    %174 = arith.sitofp %173 : vector<16x2xi32> to vector<16x2xf32>
    %cst_55 = arith.constant dense<0.000000e+00> : vector<2xf32>
    %175 = vector.multi_reduction <add>, %174, %cst_55 [0] : vector<16x2xf32> to vector<2xf32>
    %176 = vector.shape_cast %175 : vector<2xf32> to vector<1x2xf32>
    %cst_56 = arith.constant dense<0.000000e+00> : vector<4x2xf32>
    %177 = tpu.matmul %11, %174, %cst_56 {dimension_numbers = #tpu.dot_dimension_numbers<[1], [0], [0], [1], [0, 0, 1, 1], [], []>} : vector<4x16xf32>, vector<16x2xf32>, vector<4x2xf32> -> vector<4x2xf32>
    %cst_57 = arith.constant 5.000000e-01 : f32
    %178 = vector.broadcast %cst_57 : f32 to vector<1x2xf32>
    %179 = arith.cmpf ogt, %176, %178 : vector<1x2xf32>
    %cst_58 = arith.constant 1.000000e+00 : f32
    %180 = vector.broadcast %cst_58 : f32 to vector<1x2xf32>
    %181 = arith.maximumf %176, %180 : vector<1x2xf32>
    %182 = vector.broadcast %181 : vector<1x2xf32> to vector<4x2xf32>
    %183 = arith.divf %177, %182 : vector<4x2xf32>
    %184 = vector.shape_cast %179 : vector<1x2xi1> to vector<1x2xi1>
    %185 = vector.broadcast %184 : vector<1x2xi1> to vector<4x2xi1>
    %186 = arith.select %185, %183, %152 : vector<4x2xi1>, vector<4x2xf32>
    %c5_i32 = arith.constant 5 : i32
    %187 = arith.mulf %186, %186 : vector<4x2xf32>
    %cst_59 = arith.constant dense<0.000000e+00> : vector<2xf32>
    %188 = vector.multi_reduction <add>, %187, %cst_59 [0] : vector<4x2xf32> to vector<2xf32>
    %189 = vector.shape_cast %188 : vector<2xf32> to vector<1x2xf32>
    %cst_60 = arith.constant dense<0.000000e+00> : vector<16x2xf32>
    %190 = tpu.matmul %9, %186, %cst_60 {dimension_numbers = #tpu.dot_dimension_numbers<[1], [0], [0], [1], [0, 0, 1, 1], [], []>} : vector<16x4xf32>, vector<4x2xf32>, vector<16x2xf32> -> vector<16x2xf32>
    %cst_61 = arith.constant 2.000000e+00 : f32
    %191 = vector.broadcast %cst_61 : f32 to vector<16x2xf32>
    %192 = arith.mulf %191, %190 : vector<16x2xf32>
    %193 = vector.broadcast %15 : vector<16x1xf32> to vector<16x2xf32>
    %194 = arith.subf %193, %192 : vector<16x2xf32>
    %195 = vector.broadcast %189 : vector<1x2xf32> to vector<16x2xf32>
    %196 = arith.addf %194, %195 : vector<16x2xf32>
    %cst_62 = arith.constant dense<0x7F800000> : vector<16xf32>
    %197 = vector.multi_reduction <minimumf>, %196, %cst_62 [1] : vector<16x2xf32> to vector<16xf32>
    %198 = vector.shape_cast %197 : vector<16xf32> to vector<16x1xf32>
    %199 = vector.broadcast %198 : vector<16x1xf32> to vector<16x2xf32>
    %200 = arith.cmpf ole, %196, %199 : vector<16x2xf32>
    %c2_i32_63 = arith.constant 2 : i32
    %201 = vector.broadcast %c2_i32_63 : i32 to vector<16x2xi32>
    %202 = arith.select %200, %12, %201 : vector<16x2xi1>, vector<16x2xi32>
    %cst_64 = arith.constant dense<2147483647> : vector<16xi32>
    %203 = vector.multi_reduction <minsi>, %202, %cst_64 [1] : vector<16x2xi32> to vector<16xi32>
    %204 = vector.shape_cast %203 : vector<16xi32> to vector<16x1xi32>
    %205 = vector.broadcast %204 : vector<16x1xi32> to vector<16x2xi32>
    %206 = arith.cmpi eq, %12, %205 : vector<16x2xi32>
    %207 = arith.extui %206 : vector<16x2xi1> to vector<16x2xi32>
    %208 = arith.sitofp %207 : vector<16x2xi32> to vector<16x2xf32>
    %cst_65 = arith.constant dense<0.000000e+00> : vector<2xf32>
    %209 = vector.multi_reduction <add>, %208, %cst_65 [0] : vector<16x2xf32> to vector<2xf32>
    %210 = vector.shape_cast %209 : vector<2xf32> to vector<1x2xf32>
    %cst_66 = arith.constant dense<0.000000e+00> : vector<4x2xf32>
    %211 = tpu.matmul %11, %208, %cst_66 {dimension_numbers = #tpu.dot_dimension_numbers<[1], [0], [0], [1], [0, 0, 1, 1], [], []>} : vector<4x16xf32>, vector<16x2xf32>, vector<4x2xf32> -> vector<4x2xf32>
    %cst_67 = arith.constant 5.000000e-01 : f32
    %212 = vector.broadcast %cst_67 : f32 to vector<1x2xf32>
    %213 = arith.cmpf ogt, %210, %212 : vector<1x2xf32>
    %cst_68 = arith.constant 1.000000e+00 : f32
    %214 = vector.broadcast %cst_68 : f32 to vector<1x2xf32>
    %215 = arith.maximumf %210, %214 : vector<1x2xf32>
    %216 = vector.broadcast %215 : vector<1x2xf32> to vector<4x2xf32>
    %217 = arith.divf %211, %216 : vector<4x2xf32>
    %218 = vector.shape_cast %213 : vector<1x2xi1> to vector<1x2xi1>
    %219 = vector.broadcast %218 : vector<1x2xi1> to vector<4x2xi1>
    %220 = arith.select %219, %217, %186 : vector<4x2xi1>, vector<4x2xf32>
    %c6_i32 = arith.constant 6 : i32
    %221 = arith.mulf %220, %220 : vector<4x2xf32>
    %cst_69 = arith.constant dense<0.000000e+00> : vector<2xf32>
    %222 = vector.multi_reduction <add>, %221, %cst_69 [0] : vector<4x2xf32> to vector<2xf32>
    %223 = vector.shape_cast %222 : vector<2xf32> to vector<1x2xf32>
    %cst_70 = arith.constant dense<0.000000e+00> : vector<16x2xf32>
    %224 = tpu.matmul %9, %220, %cst_70 {dimension_numbers = #tpu.dot_dimension_numbers<[1], [0], [0], [1], [0, 0, 1, 1], [], []>} : vector<16x4xf32>, vector<4x2xf32>, vector<16x2xf32> -> vector<16x2xf32>
    %cst_71 = arith.constant 2.000000e+00 : f32
    %225 = vector.broadcast %cst_71 : f32 to vector<16x2xf32>
    %226 = arith.mulf %225, %224 : vector<16x2xf32>
    %227 = vector.broadcast %15 : vector<16x1xf32> to vector<16x2xf32>
    %228 = arith.subf %227, %226 : vector<16x2xf32>
    %229 = vector.broadcast %223 : vector<1x2xf32> to vector<16x2xf32>
    %230 = arith.addf %228, %229 : vector<16x2xf32>
    %cst_72 = arith.constant dense<0x7F800000> : vector<16xf32>
    %231 = vector.multi_reduction <minimumf>, %230, %cst_72 [1] : vector<16x2xf32> to vector<16xf32>
    %232 = vector.shape_cast %231 : vector<16xf32> to vector<16x1xf32>
    %233 = vector.broadcast %232 : vector<16x1xf32> to vector<16x2xf32>
    %234 = arith.cmpf ole, %230, %233 : vector<16x2xf32>
    %c2_i32_73 = arith.constant 2 : i32
    %235 = vector.broadcast %c2_i32_73 : i32 to vector<16x2xi32>
    %236 = arith.select %234, %12, %235 : vector<16x2xi1>, vector<16x2xi32>
    %cst_74 = arith.constant dense<2147483647> : vector<16xi32>
    %237 = vector.multi_reduction <minsi>, %236, %cst_74 [1] : vector<16x2xi32> to vector<16xi32>
    %238 = vector.shape_cast %237 : vector<16xi32> to vector<16x1xi32>
    %239 = vector.broadcast %238 : vector<16x1xi32> to vector<16x2xi32>
    %240 = arith.cmpi eq, %12, %239 : vector<16x2xi32>
    %241 = arith.extui %240 : vector<16x2xi1> to vector<16x2xi32>
    %242 = arith.sitofp %241 : vector<16x2xi32> to vector<16x2xf32>
    %cst_75 = arith.constant dense<0.000000e+00> : vector<2xf32>
    %243 = vector.multi_reduction <add>, %242, %cst_75 [0] : vector<16x2xf32> to vector<2xf32>
    %244 = vector.shape_cast %243 : vector<2xf32> to vector<1x2xf32>
    %cst_76 = arith.constant dense<0.000000e+00> : vector<4x2xf32>
    %245 = tpu.matmul %11, %242, %cst_76 {dimension_numbers = #tpu.dot_dimension_numbers<[1], [0], [0], [1], [0, 0, 1, 1], [], []>} : vector<4x16xf32>, vector<16x2xf32>, vector<4x2xf32> -> vector<4x2xf32>
    %cst_77 = arith.constant 5.000000e-01 : f32
    %246 = vector.broadcast %cst_77 : f32 to vector<1x2xf32>
    %247 = arith.cmpf ogt, %244, %246 : vector<1x2xf32>
    %cst_78 = arith.constant 1.000000e+00 : f32
    %248 = vector.broadcast %cst_78 : f32 to vector<1x2xf32>
    %249 = arith.maximumf %244, %248 : vector<1x2xf32>
    %250 = vector.broadcast %249 : vector<1x2xf32> to vector<4x2xf32>
    %251 = arith.divf %245, %250 : vector<4x2xf32>
    %252 = vector.shape_cast %247 : vector<1x2xi1> to vector<1x2xi1>
    %253 = vector.broadcast %252 : vector<1x2xi1> to vector<4x2xi1>
    %254 = arith.select %253, %251, %220 : vector<4x2xi1>, vector<4x2xf32>
    %c7_i32 = arith.constant 7 : i32
    %255 = arith.mulf %254, %254 : vector<4x2xf32>
    %cst_79 = arith.constant dense<0.000000e+00> : vector<2xf32>
    %256 = vector.multi_reduction <add>, %255, %cst_79 [0] : vector<4x2xf32> to vector<2xf32>
    %257 = vector.shape_cast %256 : vector<2xf32> to vector<1x2xf32>
    %cst_80 = arith.constant dense<0.000000e+00> : vector<16x2xf32>
    %258 = tpu.matmul %9, %254, %cst_80 {dimension_numbers = #tpu.dot_dimension_numbers<[1], [0], [0], [1], [0, 0, 1, 1], [], []>} : vector<16x4xf32>, vector<4x2xf32>, vector<16x2xf32> -> vector<16x2xf32>
    %cst_81 = arith.constant 2.000000e+00 : f32
    %259 = vector.broadcast %cst_81 : f32 to vector<16x2xf32>
    %260 = arith.mulf %259, %258 : vector<16x2xf32>
    %261 = vector.broadcast %15 : vector<16x1xf32> to vector<16x2xf32>
    %262 = arith.subf %261, %260 : vector<16x2xf32>
    %263 = vector.broadcast %257 : vector<1x2xf32> to vector<16x2xf32>
    %264 = arith.addf %262, %263 : vector<16x2xf32>
    %cst_82 = arith.constant dense<0x7F800000> : vector<16xf32>
    %265 = vector.multi_reduction <minimumf>, %264, %cst_82 [1] : vector<16x2xf32> to vector<16xf32>
    %266 = vector.shape_cast %265 : vector<16xf32> to vector<16x1xf32>
    %267 = vector.broadcast %266 : vector<16x1xf32> to vector<16x2xf32>
    %268 = arith.cmpf ole, %264, %267 : vector<16x2xf32>
    %c2_i32_83 = arith.constant 2 : i32
    %269 = vector.broadcast %c2_i32_83 : i32 to vector<16x2xi32>
    %270 = arith.select %268, %12, %269 : vector<16x2xi1>, vector<16x2xi32>
    %cst_84 = arith.constant dense<2147483647> : vector<16xi32>
    %271 = vector.multi_reduction <minsi>, %270, %cst_84 [1] : vector<16x2xi32> to vector<16xi32>
    %272 = vector.shape_cast %271 : vector<16xi32> to vector<16x1xi32>
    %273 = vector.broadcast %272 : vector<16x1xi32> to vector<16x2xi32>
    %274 = arith.cmpi eq, %12, %273 : vector<16x2xi32>
    %275 = arith.extui %274 : vector<16x2xi1> to vector<16x2xi32>
    %276 = arith.sitofp %275 : vector<16x2xi32> to vector<16x2xf32>
    %cst_85 = arith.constant dense<0.000000e+00> : vector<2xf32>
    %277 = vector.multi_reduction <add>, %276, %cst_85 [0] : vector<16x2xf32> to vector<2xf32>
    %278 = vector.shape_cast %277 : vector<2xf32> to vector<1x2xf32>
    %cst_86 = arith.constant dense<0.000000e+00> : vector<4x2xf32>
    %279 = tpu.matmul %11, %276, %cst_86 {dimension_numbers = #tpu.dot_dimension_numbers<[1], [0], [0], [1], [0, 0, 1, 1], [], []>} : vector<4x16xf32>, vector<16x2xf32>, vector<4x2xf32> -> vector<4x2xf32>
    %cst_87 = arith.constant 5.000000e-01 : f32
    %280 = vector.broadcast %cst_87 : f32 to vector<1x2xf32>
    %281 = arith.cmpf ogt, %278, %280 : vector<1x2xf32>
    %cst_88 = arith.constant 1.000000e+00 : f32
    %282 = vector.broadcast %cst_88 : f32 to vector<1x2xf32>
    %283 = arith.maximumf %278, %282 : vector<1x2xf32>
    %284 = vector.broadcast %283 : vector<1x2xf32> to vector<4x2xf32>
    %285 = arith.divf %279, %284 : vector<4x2xf32>
    %286 = vector.shape_cast %281 : vector<1x2xi1> to vector<1x2xi1>
    %287 = vector.broadcast %286 : vector<1x2xi1> to vector<4x2xi1>
    %288 = arith.select %287, %285, %254 : vector<4x2xi1>, vector<4x2xf32>
    %289 = arith.mulf %288, %288 : vector<4x2xf32>
    %cst_89 = arith.constant dense<0.000000e+00> : vector<2xf32>
    %290 = vector.multi_reduction <add>, %289, %cst_89 [0] : vector<4x2xf32> to vector<2xf32>
    %291 = vector.shape_cast %290 : vector<2xf32> to vector<1x2xf32>
    %cst_90 = arith.constant dense<0.000000e+00> : vector<16x2xf32>
    %292 = tpu.matmul %9, %288, %cst_90 {dimension_numbers = #tpu.dot_dimension_numbers<[1], [0], [0], [1], [0, 0, 1, 1], [], []>} : vector<16x4xf32>, vector<4x2xf32>, vector<16x2xf32> -> vector<16x2xf32>
    %cst_91 = arith.constant 2.000000e+00 : f32
    %293 = vector.broadcast %cst_91 : f32 to vector<16x2xf32>
    %294 = arith.mulf %293, %292 : vector<16x2xf32>
    %295 = vector.broadcast %15 : vector<16x1xf32> to vector<16x2xf32>
    %296 = arith.subf %295, %294 : vector<16x2xf32>
    %297 = vector.broadcast %291 : vector<1x2xf32> to vector<16x2xf32>
    %298 = arith.addf %296, %297 : vector<16x2xf32>
    %cst_92 = arith.constant dense<0x7F800000> : vector<16xf32>
    %299 = vector.multi_reduction <minimumf>, %298, %cst_92 [1] : vector<16x2xf32> to vector<16xf32>
    %300 = vector.shape_cast %299 : vector<16xf32> to vector<16x1xf32>
    %301 = vector.broadcast %300 : vector<16x1xf32> to vector<16x2xf32>
    %302 = arith.cmpf ole, %298, %301 : vector<16x2xf32>
    %c2_i32_93 = arith.constant 2 : i32
    %303 = vector.broadcast %c2_i32_93 : i32 to vector<16x2xi32>
    %304 = arith.select %302, %12, %303 : vector<16x2xi1>, vector<16x2xi32>
    %cst_94 = arith.constant dense<2147483647> : vector<16xi32>
    %305 = vector.multi_reduction <minsi>, %304, %cst_94 [1] : vector<16x2xi32> to vector<16xi32>
    %306 = vector.shape_cast %305 : vector<16xi32> to vector<16x1xi32>
    %307 = vector.broadcast %306 : vector<16x1xi32> to vector<16x2xi32>
    %308 = arith.cmpi eq, %12, %307 : vector<16x2xi32>
    %309 = arith.extui %308 : vector<16x2xi1> to vector<16x2xi32>
    %310 = arith.sitofp %309 : vector<16x2xi32> to vector<16x2xf32>
    %cst_95 = arith.constant dense<0.000000e+00> : vector<16x16xf32>
    %311 = tpu.matmul %310, %310, %cst_95 {dimension_numbers = #tpu.dot_dimension_numbers<[1], [1], [0], [0], [0, 0, 1, 0], [], []>} : vector<16x2xf32>, vector<16x2xf32>, vector<16x16xf32> -> vector<16x16xf32>
    %c16 = arith.constant 16 : index
    %c0_96 = arith.constant 0 : index
    %312 = vector.load %arg2[%c16, %c0_96] : memref<680x128xf32, #tpu.memory_space<vmem>>, vector<4x32xf32>
    %cst_97 = arith.constant dense<0.000000e+00> : vector<16x32xf32>
    %313 = tpu.matmul %9, %312, %cst_97 {dimension_numbers = #tpu.dot_dimension_numbers<[1], [0], [0], [1], [0, 0, 1, 1], [], []>} : vector<16x4xf32>, vector<4x32xf32>, vector<16x32xf32> -> vector<16x32xf32>
    %c24 = arith.constant 24 : index
    %c0_98 = arith.constant 0 : index
    %314 = vector.load %arg2[%c24, %c0_98] : memref<680x128xf32, #tpu.memory_space<vmem>>, vector<1x32xf32>
    %315 = vector.broadcast %314 : vector<1x32xf32> to vector<16x32xf32>
    %316 = arith.addf %313, %315 : vector<16x32xf32>
    %c32 = arith.constant 32 : index
    %c0_99 = arith.constant 0 : index
    %317 = vector.load %arg2[%c32, %c0_99] : memref<680x128xf32, #tpu.memory_space<vmem>>, vector<4x32xf32>
    %cst_100 = arith.constant dense<0.000000e+00> : vector<16x32xf32>
    %318 = tpu.matmul %9, %317, %cst_100 {dimension_numbers = #tpu.dot_dimension_numbers<[1], [0], [0], [1], [0, 0, 1, 1], [], []>} : vector<16x4xf32>, vector<4x32xf32>, vector<16x32xf32> -> vector<16x32xf32>
    %c40 = arith.constant 40 : index
    %c0_101 = arith.constant 0 : index
    %319 = vector.load %arg2[%c40, %c0_101] : memref<680x128xf32, #tpu.memory_space<vmem>>, vector<1x32xf32>
    %320 = vector.broadcast %319 : vector<1x32xf32> to vector<16x32xf32>
    %321 = arith.addf %318, %320 : vector<16x32xf32>
    %c400 = arith.constant 400 : index
    %c0_102 = arith.constant 0 : index
    %322 = vector.load %arg2[%c400, %c0_102] : memref<680x128xf32, #tpu.memory_space<vmem>>, vector<4x32xf32>
    %cst_103 = arith.constant dense<0.000000e+00> : vector<16x32xf32>
    %323 = tpu.matmul %9, %322, %cst_103 {dimension_numbers = #tpu.dot_dimension_numbers<[1], [0], [0], [1], [0, 0, 1, 1], [], []>} : vector<16x4xf32>, vector<4x32xf32>, vector<16x32xf32> -> vector<16x32xf32>
    %324 = arith.mulf %323, %321 : vector<16x32xf32>
    %c456 = arith.constant 456 : index
    %c0_104 = arith.constant 0 : index
    %325 = vector.load %arg2[%c456, %c0_104] : memref<680x128xf32, #tpu.memory_space<vmem>>, vector<32x8xf32>
    %cst_105 = arith.constant dense<0.000000e+00> : vector<16x8xf32>
    %326 = tpu.matmul %324, %325, %cst_105 {dimension_numbers = #tpu.dot_dimension_numbers<[1], [0], [0], [1], [0, 0, 1, 1], [], []>} : vector<16x32xf32>, vector<32x8xf32>, vector<16x8xf32> -> vector<16x8xf32>
    %c616 = arith.constant 616 : index
    %c0_106 = arith.constant 0 : index
    %327 = vector.load %arg2[%c616, %c0_106] : memref<680x128xf32, #tpu.memory_space<vmem>>, vector<8x128xf32>
    %cst_107 = arith.constant dense<0.000000e+00> : vector<16x128xf32>
    %328 = tpu.matmul %326, %327, %cst_107 {dimension_numbers = #tpu.dot_dimension_numbers<[1], [0], [0], [1], [0, 0, 1, 1], [], []>} : vector<16x8xf32>, vector<8x128xf32>, vector<16x128xf32> -> vector<16x128xf32>
    %c424 = arith.constant 424 : index
    %c0_108 = arith.constant 0 : index
    %329 = vector.load %arg2[%c424, %c0_108] : memref<680x128xf32, #tpu.memory_space<vmem>>, vector<32x4xf32>
    %cst_109 = arith.constant dense<0.000000e+00> : vector<32x16xf32>
    %330 = tpu.matmul %329, %11, %cst_109 {dimension_numbers = #tpu.dot_dimension_numbers<[1], [0], [0], [1], [0, 0, 1, 1], [], []>} : vector<32x4xf32>, vector<4x16xf32>, vector<32x16xf32> -> vector<32x16xf32>
    %c408 = arith.constant 408 : index
    %c0_110 = arith.constant 0 : index
    %331 = vector.load %arg2[%c408, %c0_110] : memref<680x128xf32, #tpu.memory_space<vmem>>, vector<16x128xf32>
    %cst_111 = arith.constant dense<0.000000e+00> : vector<32x128xf32>
    %332 = tpu.matmul %330, %331, %cst_111 {dimension_numbers = #tpu.dot_dimension_numbers<[1], [0], [0], [1], [0, 0, 1, 1], [], []>} : vector<32x16xf32>, vector<16x128xf32>, vector<32x128xf32> -> vector<32x128xf32>
    %c624 = arith.constant 624 : index
    %c0_112 = arith.constant 0 : index
    %333 = vector.load %arg2[%c624, %c0_112] : memref<680x128xf32, #tpu.memory_space<vmem>>, vector<32x128xf32>
    %334 = arith.mulf %332, %333 : vector<32x128xf32>
    %cst_113 = arith.constant dense<0.000000e+00> : vector<16x128xf32>
    %335 = tpu.matmul %316, %334, %cst_113 {dimension_numbers = #tpu.dot_dimension_numbers<[1], [0], [0], [1], [0, 0, 1, 1], [], []>} : vector<16x32xf32>, vector<32x128xf32>, vector<16x128xf32> -> vector<16x128xf32>
    %336 = arith.addf %335, %328 : vector<16x128xf32>
    %c48 = arith.constant 48 : index
    %c0_114 = arith.constant 0 : index
    %337 = vector.load %arg2[%c48, %c0_114] : memref<680x128xf32, #tpu.memory_space<vmem>>, vector<128x128xf32>
    %cst_115 = arith.constant dense<0.000000e+00> : vector<16x128xf32>
    %338 = tpu.matmul %336, %337, %cst_115 {dimension_numbers = #tpu.dot_dimension_numbers<[1], [0], [0], [1], [0, 0, 1, 1], [], []>} : vector<16x128xf32>, vector<128x128xf32>, vector<16x128xf32> -> vector<16x128xf32>
    %c176 = arith.constant 176 : index
    %c0_116 = arith.constant 0 : index
    %339 = vector.load %arg2[%c176, %c0_116] : memref<680x128xf32, #tpu.memory_space<vmem>>, vector<1x128xf32>
    %340 = vector.broadcast %339 : vector<1x128xf32> to vector<16x128xf32>
    %341 = arith.addf %338, %340 : vector<16x128xf32>
    %c184 = arith.constant 184 : index
    %c0_117 = arith.constant 0 : index
    %342 = vector.load %arg2[%c184, %c0_117] : memref<680x128xf32, #tpu.memory_space<vmem>>, vector<128x16xf32>
    %cst_118 = arith.constant dense<0.000000e+00> : vector<16x16xf32>
    %343 = tpu.matmul %341, %342, %cst_118 {dimension_numbers = #tpu.dot_dimension_numbers<[1], [0], [0], [1], [0, 0, 1, 1], [], []>} : vector<16x128xf32>, vector<128x16xf32>, vector<16x16xf32> -> vector<16x16xf32>
    %c312 = arith.constant 312 : index
    %c0_119 = arith.constant 0 : index
    %344 = vector.load %arg2[%c312, %c0_119] : memref<680x128xf32, #tpu.memory_space<vmem>>, vector<1x1xf32>
    %345 = vector.broadcast %344 : vector<1x1xf32> to vector<16x16xf32>
    %346 = arith.addf %343, %345 : vector<16x16xf32>
    %cst_120 = arith.constant 5.000000e-01 : f32
    %347 = vector.broadcast %cst_120 : f32 to vector<16x16xf32>
    %348 = arith.cmpf ogt, %311, %347 : vector<16x16xf32>
    %cst_121 = arith.constant -1.000000e+30 : f32
    %349 = vector.broadcast %cst_121 : f32 to vector<16x16xf32>
    %350 = arith.select %348, %346, %349 : vector<16x16xi1>, vector<16x16xf32>
    %cst_122 = arith.constant dense<0xFF800000> : vector<16xf32>
    %351 = vector.multi_reduction <maximumf>, %350, %cst_122 [1] : vector<16x16xf32> to vector<16xf32>
    %352 = vector.shape_cast %351 : vector<16xf32> to vector<16x1xf32>
    %cst_123 = arith.constant 5.000000e-01 : f32
    %353 = vector.broadcast %cst_123 : f32 to vector<16x16xf32>
    %354 = arith.cmpf ogt, %311, %353 : vector<16x16xf32>
    %355 = vector.broadcast %352 : vector<16x1xf32> to vector<16x16xf32>
    %356 = arith.subf %350, %355 : vector<16x16xf32>
    %357 = math.exp %356 : vector<16x16xf32>
    %cst_124 = arith.constant 0.000000e+00 : f32
    %358 = vector.broadcast %cst_124 : f32 to vector<16x16xf32>
    %359 = arith.select %354, %357, %358 : vector<16x16xi1>, vector<16x16xf32>
    %cst_125 = arith.constant dense<0.000000e+00> : vector<16xf32>
    %360 = vector.multi_reduction <add>, %359, %cst_125 [1] : vector<16x16xf32> to vector<16xf32>
    %361 = vector.shape_cast %360 : vector<16xf32> to vector<16x1xf32>
    %362 = tpu.reciprocal %361 {approx = true} : vector<16x1xf32> -> vector<16x1xf32>
    %363 = vector.broadcast %362 : vector<16x1xf32> to vector<16x16xf32>
    %364 = arith.mulf %359, %363 : vector<16x16xf32>
    %c408_126 = arith.constant 408 : index
    %c0_127 = arith.constant 0 : index
    %365 = vector.load %arg2[%c408_126, %c0_127] : memref<680x128xf32, #tpu.memory_space<vmem>>, vector<16x128xf32>
    %cst_128 = arith.constant dense<0.000000e+00> : vector<16x128xf32>
    %366 = tpu.matmul %364, %365, %cst_128 {dimension_numbers = #tpu.dot_dimension_numbers<[1], [0], [0], [1], [0, 0, 1, 1], [], []>} : vector<16x16xf32>, vector<16x128xf32>, vector<16x128xf32> -> vector<16x128xf32>
    %367 = arith.mulf %366, %341 : vector<16x128xf32>
    %c488 = arith.constant 488 : index
    %c0_129 = arith.constant 0 : index
    %368 = vector.load %arg2[%c488, %c0_129] : memref<680x128xf32, #tpu.memory_space<vmem>>, vector<128x8xf32>
    %cst_130 = arith.constant dense<0.000000e+00> : vector<16x8xf32>
    %369 = tpu.matmul %367, %368, %cst_130 {dimension_numbers = #tpu.dot_dimension_numbers<[1], [0], [0], [1], [0, 0, 1, 1], [], []>} : vector<16x128xf32>, vector<128x8xf32>, vector<16x8xf32> -> vector<16x8xf32>
    %c320 = arith.constant 320 : index
    %c0_131 = arith.constant 0 : index
    %370 = vector.load %arg2[%c320, %c0_131] : memref<680x128xf32, #tpu.memory_space<vmem>>, vector<8x8xf32>
    %cst_132 = arith.constant dense<0.000000e+00> : vector<16x8xf32>
    %371 = tpu.matmul %369, %370, %cst_132 {dimension_numbers = #tpu.dot_dimension_numbers<[1], [0], [0], [1], [0, 0, 1, 1], [], []>} : vector<16x8xf32>, vector<8x8xf32>, vector<16x8xf32> -> vector<16x8xf32>
    %c328 = arith.constant 328 : index
    %c0_133 = arith.constant 0 : index
    %372 = vector.load %arg2[%c328, %c0_133] : memref<680x128xf32, #tpu.memory_space<vmem>>, vector<1x8xf32>
    %373 = vector.broadcast %372 : vector<1x8xf32> to vector<16x8xf32>
    %374 = arith.addf %371, %373 : vector<16x8xf32>
    %c656 = arith.constant 656 : index
    %c0_134 = arith.constant 0 : index
    %375 = vector.load %arg2[%c656, %c0_134] : memref<680x128xf32, #tpu.memory_space<vmem>>, vector<4x8xf32>
    %cst_135 = arith.constant dense<0.000000e+00> : vector<16x8xf32>
    %376 = tpu.matmul %9, %375, %cst_135 {dimension_numbers = #tpu.dot_dimension_numbers<[1], [0], [0], [1], [0, 0, 1, 1], [], []>} : vector<16x4xf32>, vector<4x8xf32>, vector<16x8xf32> -> vector<16x8xf32>
    %c336 = arith.constant 336 : index
    %c0_136 = arith.constant 0 : index
    %377 = vector.load %arg2[%c336, %c0_136] : memref<680x128xf32, #tpu.memory_space<vmem>>, vector<8x8xf32>
    %cst_137 = arith.constant dense<0.000000e+00> : vector<16x8xf32>
    %378 = tpu.matmul %376, %377, %cst_137 {dimension_numbers = #tpu.dot_dimension_numbers<[1], [0], [0], [1], [0, 0, 1, 1], [], []>} : vector<16x8xf32>, vector<8x8xf32>, vector<16x8xf32> -> vector<16x8xf32>
    %c344 = arith.constant 344 : index
    %c0_138 = arith.constant 0 : index
    %379 = vector.load %arg2[%c344, %c0_138] : memref<680x128xf32, #tpu.memory_space<vmem>>, vector<1x8xf32>
    %380 = vector.broadcast %379 : vector<1x8xf32> to vector<16x8xf32>
    %381 = arith.addf %378, %380 : vector<16x8xf32>
    %c352 = arith.constant 352 : index
    %c0_139 = arith.constant 0 : index
    %382 = vector.load %arg2[%c352, %c0_139] : memref<680x128xf32, #tpu.memory_space<vmem>>, vector<8x8xf32>
    %cst_140 = arith.constant dense<0.000000e+00> : vector<16x8xf32>
    %383 = tpu.matmul %374, %382, %cst_140 {dimension_numbers = #tpu.dot_dimension_numbers<[1], [0], [0], [1], [0, 0, 1, 1], [], []>} : vector<16x8xf32>, vector<8x8xf32>, vector<16x8xf32> -> vector<16x8xf32>
    %c360 = arith.constant 360 : index
    %c0_141 = arith.constant 0 : index
    %384 = vector.load %arg2[%c360, %c0_141] : memref<680x128xf32, #tpu.memory_space<vmem>>, vector<1x8xf32>
    %385 = vector.broadcast %384 : vector<1x8xf32> to vector<16x8xf32>
    %386 = arith.addf %383, %385 : vector<16x8xf32>
    %387 = arith.maximumf %381, %386 : vector<16x8xf32>
    %388 = arith.subf %381, %387 : vector<16x8xf32>
    %389 = math.exp %388 : vector<16x8xf32>
    %390 = arith.subf %386, %387 : vector<16x8xf32>
    %391 = math.exp %390 : vector<16x8xf32>
    %392 = arith.mulf %389, %376 : vector<16x8xf32>
    %393 = arith.mulf %391, %374 : vector<16x8xf32>
    %394 = arith.addf %392, %393 : vector<16x8xf32>
    %395 = arith.addf %389, %391 : vector<16x8xf32>
    %396 = tpu.reciprocal %395 {approx = true} : vector<16x8xf32> -> vector<16x8xf32>
    %397 = arith.mulf %394, %396 : vector<16x8xf32>
    %c664 = arith.constant 664 : index
    %c0_142 = arith.constant 0 : index
    %398 = vector.load %arg2[%c664, %c0_142] : memref<680x128xf32, #tpu.memory_space<vmem>>, vector<2x16xf32>
    %cst_143 = arith.constant dense<0.000000e+00> : vector<16x16xf32>
    %399 = tpu.matmul %310, %398, %cst_143 {dimension_numbers = #tpu.dot_dimension_numbers<[1], [0], [0], [1], [0, 0, 1, 1], [], []>} : vector<16x2xf32>, vector<2x16xf32>, vector<16x16xf32> -> vector<16x16xf32>
    %c672 = arith.constant 672 : index
    %c0_144 = arith.constant 0 : index
    %400 = vector.load %arg2[%c672, %c0_144] : memref<680x128xf32, #tpu.memory_space<vmem>>, vector<8x16xf32>
    %cst_145 = arith.constant dense<0.000000e+00> : vector<16x16xf32>
    %401 = tpu.matmul %397, %400, %cst_145 {dimension_numbers = #tpu.dot_dimension_numbers<[1], [0], [0], [1], [0, 0, 1, 1], [], []>} : vector<16x8xf32>, vector<8x16xf32>, vector<16x16xf32> -> vector<16x16xf32>
    %cst_146 = arith.constant 5.000000e-01 : f32
    %402 = vector.broadcast %cst_146 : f32 to vector<16x16xf32>
    %403 = arith.cmpf ogt, %399, %402 : vector<16x16xf32>
    %cst_147 = arith.constant -1.000000e+30 : f32
    %404 = vector.broadcast %cst_147 : f32 to vector<16x16xf32>
    %405 = arith.select %403, %401, %404 : vector<16x16xi1>, vector<16x16xf32>
    %cst_148 = arith.constant dense<0xFF800000> : vector<16xf32>
    %406 = vector.multi_reduction <maximumf>, %405, %cst_148 [0] : vector<16x16xf32> to vector<16xf32>
    %407 = vector.shape_cast %406 : vector<16xf32> to vector<1x16xf32>
    %cst_149 = arith.constant dense<0.000000e+00> : vector<16xf32>
    %408 = vector.multi_reduction <add>, %399, %cst_149 [0] : vector<16x16xf32> to vector<16xf32>
    %409 = vector.shape_cast %408 : vector<16xf32> to vector<1x16xf32>
    %cst_150 = arith.constant 5.000000e-01 : f32
    %410 = vector.broadcast %cst_150 : f32 to vector<1x16xf32>
    %411 = arith.cmpf ogt, %409, %410 : vector<1x16xf32>
    %cst_151 = arith.constant 0.000000e+00 : f32
    %412 = vector.broadcast %cst_151 : f32 to vector<1x16xf32>
    %413 = arith.select %411, %407, %412 : vector<1x16xi1>, vector<1x16xf32>
    %c368 = arith.constant 368 : index
    %c0_152 = arith.constant 0 : index
    %414 = vector.load %arg2[%c368, %c0_152] : memref<680x128xf32, #tpu.memory_space<vmem>>, vector<16x32xf32>
    %cst_153 = arith.constant dense<0.000000e+00> : vector<1x32xf32>
    %415 = tpu.matmul %413, %414, %cst_153 {dimension_numbers = #tpu.dot_dimension_numbers<[1], [0], [0], [1], [0, 0, 1, 1], [], []>} : vector<1x16xf32>, vector<16x32xf32>, vector<1x32xf32> -> vector<1x32xf32>
    %c384 = arith.constant 384 : index
    %c0_154 = arith.constant 0 : index
    %416 = vector.load %arg2[%c384, %c0_154] : memref<680x128xf32, #tpu.memory_space<vmem>>, vector<1x32xf32>
    %417 = arith.addf %415, %416 : vector<1x32xf32>
    %c0_155 = arith.constant 0 : index
    %c0_156 = arith.constant 0 : index
    %c0_157 = arith.constant 0 : index
    %418 = vector.load %arg3[%c0_155, %c0_156, %c0_157] : memref<1x16x8xf32, #tpu.memory_space<vmem>>, vector<1x16x8xf32>
    %419 = vector.shape_cast %418 : vector<1x16x8xf32> to vector<16x8xf32>
    %420 = vector.shape_cast %397 : vector<16x8xf32> to vector<1x16x8xf32>
    tpu.vector_store %arg3[%c0_155, %c0_156, %c0_157], %420 {strides = array<i32>} : memref<1x16x8xf32, #tpu.memory_space<vmem>>, vector<1x16x8xf32>,
    %c0_158 = arith.constant 0 : index
    %c0_159 = arith.constant 0 : index
    %c0_160 = arith.constant 0 : index
    %421 = vector.load %arg4[%c0_158, %c0_159, %c0_160] : memref<1x1x32xf32, #tpu.memory_space<vmem>>, vector<1x1x32xf32>
    %422 = vector.shape_cast %421 : vector<1x1x32xf32> to vector<1x32xf32>
    %423 = vector.shape_cast %417 : vector<1x32xf32> to vector<1x1x32xf32>
    tpu.vector_store %arg4[%c0_158, %c0_159, %c0_160], %423 {strides = array<i32>} : memref<1x1x32xf32, #tpu.memory_space<vmem>>, vector<1x1x32xf32>,
    return
  }
  func.func @transform_0(%arg0: i32) -> (i32, i32, i32) {
    %c0_i32 = arith.constant 0 : i32
    %c0_i32_0 = arith.constant 0 : i32
    %c0_i32_1 = arith.constant 0 : i32
    return %arg0, %c0_i32, %c0_i32_0 : i32, i32, i32
  }
  func.func @transform_1(%arg0: i32) -> (i32, i32) {
    %c0_i32 = arith.constant 0 : i32
    %c0_i32_0 = arith.constant 0 : i32
    %c0_i32_1 = arith.constant 0 : i32
    return %c0_i32, %c0_i32_0 : i32, i32
  }
  func.func @transform_2(%arg0: i32) -> (i32, i32, i32) {
    %c0_i32 = arith.constant 0 : i32
    %c0_i32_0 = arith.constant 0 : i32
    %c0_i32_1 = arith.constant 0 : i32
    return %arg0, %c0_i32, %c0_i32_0 : i32, i32, i32
  }
  func.func @transform_3(%arg0: i32) -> (i32, i32, i32) {
    %c0_i32 = arith.constant 0 : i32
    %c0_i32_0 = arith.constant 0 : i32
    %c0_i32_1 = arith.constant 0 : i32
    return %arg0, %c0_i32, %c0_i32_0 : i32, i32, i32
  }
}

</mosaic_0001>

<bundles_post_ra>
// kernel: expanding_layer_forward.1
= control target key start
LH: loop header
LB: loop body
LE: loop exit
PB: predicated region body
PF: predicated region fallthrough
CT: control target
= control target key end

     0   :  { %s5080_s12 = smov 0   ;;  %s5808_s0 = inlined_call_operand.vmem [shape: f32[2,16,4], index: 0, kind: input, shape index: {}]   ;;  %s5809_s1 = inlined_call_operand.vmem [shape: f32[680,128], index: 1, kind: input, shape index: {}]   ;;  %s5810_s2 = inlined_call_operand.vmem [shape: f32[2,16,8], index: 2, kind: output, shape index: {0}]   ;;  %s5811_s3 = inlined_call_operand.vmem [shape: f32[2,1,32], index: 3, kind: output, shape index: {1}]  }
   0x1 LB: > { %s4195_s13 = sadd.s32 4294967295, %s5054_s12   ;;  %p4199_p0 = scmp.ge.s32.totalorder %s5054_s12, 1  ;;  %s5054_s12 = sphi %s5080_s12, %s14_s12  }
   0x2   : > { %p140_p1 = scmp.lt.s32.totalorder %s5054_s12, 3 }
   0x4   : > { %p141_p2 = pnand %p4199_p0, %p140_p1 }
   0x5   : > { %v182_v0 = vld [vmem:[%s5809_s1] sm:$0xf] (!%p141_p2)  ;;  %vm195_vm0 = vcmask (!%p141_p2), 1043456   ;;  %p167_p3 = scmp.lt.s32.totalorder (!%p141_p2), %s4195_s13, 1  ;;  %vm188_vm1 = vcmask (!%p141_p2), 31744   ;;  %v5056_v3 = vmov (!%p141_p2), 0.0|0.0   ;;  %v356_v40 = vlaneseq (!%p141_p2) }
   0x6   : > { %144 = sbr.rel (%p141_p2) target bundleno = 11367 (0x2c67), region = 28  ;;  %4510 = vmatprep.subr.msk.mxu0 (!%p141_p2), %vm195_vm0, %v182_v0  ;;  %4839 = vmatprep.subr.bf16.mxu1 (!%p141_p2), %v5056_v3  ;;  %vm5057_vm2 = vmmov (!%p141_p2), 0   ;;  %v5058_v4 = vmov (!%p141_p2), 0.0   ;;  %v4204_v5 = vld [vmem:[%s5809_s1 + $0x8] ss:$0 sm:$0xff] (!%p141_p2)  ;;  %vm4841_vm3 = vmpackc.low (!%p141_p2), %vm188_vm1, %vm188_vm1  ;;  %vm367_vm4 = vcmask (!%p141_p2), 11264  }
   0x7   : > { %4511 = vmatpush3.msk.msra.mxu0 (!%p141_p2), %vm195_vm0, %v182_v0  ;;  %4519 = vmatprep.mubr.msk.f32.mxu1 (!%p141_p2), %vm5057_vm2, %v5058_v4  ;;  %v276_v17 = vld [vmem:[%s5809_s1 + $0x188] sm:$0xf] (!%p141_p2)  ;;  %vm459_vm5 = vcmask (!%p141_p2), 15360   ;;  %v5153_v41 = vand.u32 (!%p141_p2), 127, %v356_v40  ;;  %vm515_vm13 = vcmask (!%p141_p2), 130048  }
   0xd   : > { %s5813_s13 = smov (!%p167_p3, %s4195_s13), 1 }
   0xe   : > { %s4333_s16 = sshll.u32 %s5813_s13, 4  ;;  %s179_s25 = scalar_lea.vmem %s5811_s3, %s5813_s13 }
   0xf   : > { %s171_s19 = scalar_lea.vmem %s5808_s0, %s4333_s16  ;;  %s176_s17 = scalar_lea.vmem %s5810_s2, %s4333_s16 }
  0x10   : > { %v180_v1 = vld [vmem:[%s171_s19] sm:$0xff]  ;;  %v181_v2 = vld [vmem:[%s171_s19 + $0x8] sm:$0xff] }
  0x11   : > { %4512 = vmatprep.mubr.msk.f32.mxu0 %vm188_vm1, %v180_v1 }
  0x12   : > { %4513 = vmatmul.mubr.msk.f32.vlgmr.msra.gmra.mrb[0].mxu0 %vm188_vm1, %v181_v2 }
  0xe5   : > { %v4514_v6 = vpop.f32.mrb[0].mxu0 }
  0xe6   : > { %v271_v7 = vadd.f32 %v4514_v6, %v4204_v5  ;;  %v265_v8 = vpop.f32.mrb[1].mxu0 }
  0xe7   : > { %v266_v9 = vadd.f32 %v4204_v5, %v265_v8 }
  0xe8   : > { %v5109_v10 = vadd.f32 %v271_v7, %v181_v2 }
  0xe9   : > { %v5111_v11 = vadd.f32 %v266_v9, %v180_v1 }
  0xea   : > { %v359_v15 = vmul.f32 %v5109_v10, %v5109_v10 }
  0xeb   : > { %4524 = vmatprep.mubr.msk.f32.mxu0 %vm188_vm1, %v5111_v11  ;;  %v4840_v12 = vpack.c.bf16 %v5109_v10, %v5111_v11  ;;  %v358_v13 = vmul.f32 %v5111_v11, %v5111_v11 }
  0xec   : > { %v363_v16 = vsel %vm188_vm1, %v359_v15, 0.0 }
  0xed   : > { %4842 = vmatpush3.bf16.xpose.msk.msra.mxu1 %vm4841_vm3, %v4840_v12  ;;  %v360_v14 = vsel %vm188_vm1, %v358_v13, 0.0 }
  0xee   : > { %361 = vadd.xlane.f32.xlu0 %v360_v14  ;;  %v5059_v14 = vmov 1.0|1.0  }
  0xf2   : > { %364 = vadd.xlane.f32.xlu0 %v363_v16 }
  0xf4   : > { %4520 = vmatmul.mubr.msk.f32.vlgmr.msra.gmra.mrb[0].mxu1 %vm188_vm1, %v276_v17 }
  0xf5   : > { %4536 = vmatprep.mubr.msk.f32.mxu1 %vm188_vm1, %v5111_v11 }
 0x17b   : > { %v5145_v26 = vpop.xlane.xlu0 %361 }
 0x17f   : > { %v5147_v31 = vpop.xlane.xlu0 %364 }
 0x1c7   : > { %v5131_v18 = vpop.f32.mrb[0].mxu1 }
 0x1c8   : > { %v4521_v19 = vpop.f32.mrb[1].mxu1  ;;  %4522 = vmatprep.subr.msk.mxu0 %vm195_vm0, %v5131_v18  ;;  %v366_v20 = vmul.f32 %v5131_v18, %v5131_v18 }
 0x1c9   : > { %4523 = vmatpush3.msk.msra.mxu0 %vm195_vm0, %v5131_v18 }
 0x1ca   : > { %4525 = vmatmul.mubr.msk.f32.vlgmr.msra.gmra.mrb[2].mxu0 %vm188_vm1, %v5109_v10  ;;  %4843 = vmatprep.subr.bf16.mxu0 %v5056_v3  ;;  %v368_v21 = vsel %vm367_vm4, %v366_v20, 0.0 }
 0x1cb   : > { %4531 = vmatprep.mubr.msk.f32.mxu0 %vm5057_vm2, %v5058_v4  ;;  %v369_v22 = vrot.slane %v368_v21, 4 }
 0x1cd   : > { %v370_v23 = vadd.f32 %v369_v22, %v368_v21 }
 0x1cf   : > { %v371_v24 = vrot.slane %v370_v23, 2 }
 0x1d1   : > { %v372_v25 = vadd.f32 %v371_v24, %v370_v23 }
 0x1d3   : > { %v373_v27 = vrot.slane %v372_v25, 1 }
 0x1d5   : > { %v374_v34 = vadd.f32 %v373_v27, %v372_v25 }
 0x29d   : > { %v4526_v28 = vpop.f32.mrb[2].mxu0 }
 0x29e   : > { %v454_v29 = vmul.f32 2.0, %v4526_v28  ;;  %v444_v30 = vpop.f32.mrb[3].mxu0 }
 0x29f   : > { %v453_v32 = vmul.f32 2.0, %v444_v30 }
 0x2a0   : > { %v456_v33 = vsub.f32 %v5147_v31, %v454_v29 }
 0x2a1   : > { %v455_v35 = vsub.f32 %v5145_v26, %v453_v32 }
 0x2a2   : > { %v458_v36 = vadd.f32 %v456_v33, %v374_v34 }
 0x2a3   : > { %v457_v37 = vadd.f32 %v455_v35, %v374_v34 }
 0x2a4   : > { %v463_v39 = vsel %vm459_vm5, %v458_v36, inf }
 0x2a5   : > { %v460_v38 = vsel %vm459_vm5, %v457_v37, inf }
 0x2a6   : > { %461 = vmin.xlane.f32.xlu1 %v460_v38 }
 0x2aa   : > { %464 = vmin.xlane.f32.xlu1 %v463_v39 }
 0x333   : > { %v462_v42 = vpop.xlane.xlu1 %461 }
 0x334   : > { %vm466_vm6 = vcmp.le.f32.partialorder %v457_v37, %v462_v42 }
 0x335   : > { %v468_v43 = vsel %vm466_vm6, %v5153_v41, 2 }
 0x336   : > { %v470_v44 = vsel %vm459_vm5, %v468_v43, 2147483647 }
 0x337   : > { %v465_v45 = vpop.xlane.xlu1 %464  ;;  %v472_v46 = vshra.s32 %v470_v44, 16  ;;  %v471_v52 = vand.u32 65535, %v470_v44 }
 0x338   : > { %vm467_vm7 = vcmp.le.f32.partialorder %v458_v36, %v465_v45 }
 0x339   : > { %v469_v47 = vsel %vm467_vm7, %v5153_v41, 2  ;;  %v474_v48 = vcvt.s32.f32 %v472_v46  ;;  %v473_v54 = vcvt.s32.f32 %v471_v52 }
 0x33a   : > { %v485_v49 = vsel %vm459_vm5, %v469_v47, 2147483647 }
 0x33b   : > { %475 = vmin.xlane.f32.xlu0 %v474_v48  ;;  %v487_v50 = vshra.s32 %v485_v49, 16  ;;  %v486_v55 = vand.u32 65535, %v485_v49 }
 0x33d   : > { %v489_v51 = vcvt.s32.f32 %v487_v50  ;;  %v488_v58 = vcvt.s32.f32 %v486_v55 }
 0x33f   : > { %490 = vmin.xlane.f32.xlu1 %v489_v51 }
 0x3c8   : > { %v476_v53 = vpop.xlane.xlu0 %475 }
 0x3c9   : > { %vm477_vm8 = vcmp.eq.f32.partialorder %v474_v48, %v476_v53  ;;  %v482_v60 = vcvt.f32.s32 %v476_v53 }
 0x3ca   : > { %v478_v56 = vsel %vm477_vm8, %v473_v54, inf }
 0x3cb   : > { %479 = vmin.xlane.f32.xlu0 %v478_v56  ;;  %v483_v62 = vshll.u32 %v482_v60, 16 }
 0x3cc   : > { %v491_v57 = vpop.xlane.xlu1 %490 }
 0x3cd   : > { %vm492_vm9 = vcmp.eq.f32.partialorder %v489_v51, %v491_v57  ;;  %v497_v63 = vcvt.f32.s32 %v491_v57 }
 0x3ce   : > { %v493_v59 = vsel %vm492_vm9, %v488_v58, inf }
 0x3cf   : > { %494 = vmin.xlane.f32.xlu1 %v493_v59  ;;  %v498_v5 = vshll.u32 %v497_v63, 16 }
 0x458   : > { %v480_v61 = vpop.xlane.xlu0 %479 }
 0x459   : > { %v481_v0 = vcvt.f32.s32 %v480_v61 }
 0x45b   : > { %v484_v1 = vadd.s32 %v483_v62, %v481_v0 }
 0x45c   : > { %v495_v2 = vpop.xlane.xlu1 %494 }
 0x45d   : > { %vm500_vm10 = vcmp.eq.s32.totalorder %v5153_v41, %v484_v1  ;;  %v496_v6 = vcvt.f32.s32 %v495_v2 }
 0x45e   : > { %v4214_v8 = vsel %vm500_vm10, 1.0, %v5058_v4 }
 0x45f   : > { %v499_v7 = vadd.s32 %v498_v5, %v496_v6  ;;  %v506_v12 = vsel %vm459_vm5, %v4214_v8, 0.0 }
 0x461   : > { %vm501_vm11 = vcmp.eq.s32.totalorder %v5153_v41, %v499_v7 }
 0x462   : > { %v4215_v9 = vsel %vm501_vm11, 1.0, %v5058_v4  ;;  %vm4844_vm12 = vmpackc.low %vm501_vm11, %vm500_vm10 }
 0x463   : > { %v507_v13 = vsel %vm459_vm5, %v4215_v9, 0.0  ;;  %4845 = vmatpush3.bf16.msk.msra.mxu0 %vm4844_vm12, %v5059_v14 }
 0x464   : > { %v508_v15 = vadd.f32 %v507_v13, %v506_v12  ;;  %4846 = vmatprep.subr.bf16.mxu0 %v5056_v3 }
 0x466   : > { %4532 = vmatmul.mubr.msk.f32.vlgmr.msra.gmra.mrb[4].mxu0 %vm515_vm13, %v5131_v18  ;;  %v509_v16 = vrot.slane %v508_v15, 4 }
 0x467   : > { %4543 = vmatprep.mubr.msk.f32.mxu0 %vm5057_vm2, %v5058_v4 }
 0x468   : > { %v510_v17 = vadd.f32 %v509_v16, %v508_v15 }
 0x46a   : > { %v511_v19 = vrot.slane %v510_v17, 2 }
 0x46c   : > { %v512_v20 = vadd.f32 %v511_v19, %v510_v17 }
 0x46e   : > { %v513_v21 = vrot.slane %v512_v20, 1 }
 0x470   : > { %v514_v22 = vadd.f32 %v513_v21, %v512_v20 }
 0x472   : > { %v589_v23 = vmax.f32 %v514_v22, 1.0  ;;  %vm588_vm14 = vcmp.gt.f32.partialorder %v514_v22, 0.5 }
 0x474   : > { %5012 = vrcp.f32 %v589_v23 }
 0x47e   : > { %v5013_v24 = vpop.eup %5012 }
 0x539   : > { %v584_v25 = vpop.f32.mrb[4].mxu0 }
 0x53a   : > { %v591_v27 = vmul.f32 %v5013_v24, %v584_v25  ;;  %v4533_v28 = vpop.f32.mrb[5].mxu0 }
 0x53c   : > { %v5172_v29 = vsel %vm588_vm14, %v591_v27, %v5131_v18 }
 0x53d   : > { %4534 = vmatprep.subr.msk.mxu1 %vm195_vm0, %v5172_v29  ;;  %v595_v30 = vmul.f32 %v5172_v29, %v5172_v29 }
 0x53e   : > { %4535 = vmatpush3.msk.msra.mxu1 %vm195_vm0, %v5172_v29 }
 0x53f   : > { %4537 = vmatmul.mubr.msk.f32.vlgmr.msra.gmra.mrb[2].mxu1 %vm188_vm1, %v5109_v10  ;;  %v596_v32 = vsel %vm367_vm4, %v595_v30, 0.0 }
 0x540   : > { %4548 = vmatprep.mubr.msk.f32.mxu1 %vm188_vm1, %v5111_v11  ;;  %v597_v33 = vrot.slane %v596_v32, 4 }
 0x542   : > { %v598_v34 = vadd.f32 %v597_v33, %v596_v32 }
 0x544   : > { %v599_v35 = vrot.slane %v598_v34, 2 }
 0x546   : > { %v600_v36 = vadd.f32 %v599_v35, %v598_v34 }
 0x548   : > { %v601_v37 = vrot.slane %v600_v36, 1 }
 0x54a   : > { %v602_v44 = vadd.f32 %v601_v37, %v600_v36 }
 0x612   : > { %v4538_v38 = vpop.f32.mrb[2].mxu1 }
 0x613   : > { %v682_v39 = vmul.f32 2.0, %v4538_v38  ;;  %v672_v40 = vpop.f32.mrb[3].mxu1 }
 0x614   : > { %v681_v42 = vmul.f32 2.0, %v672_v40 }
 0x615   : > { %v684_v43 = vsub.f32 %v5147_v31, %v682_v39 }
 0x616   : > { %v683_v45 = vsub.f32 %v5145_v26, %v681_v42 }
 0x617   : > { %v686_v46 = vadd.f32 %v684_v43, %v602_v44 }
 0x618   : > { %v685_v47 = vadd.f32 %v683_v45, %v602_v44 }
 0x619   : > { %v690_v48 = vsel %vm459_vm5, %v686_v46, inf }
 0x61a   : > { %691 = vmin.xlane.f32.xlu1 %v690_v48  ;;  %v687_v49 = vsel %vm459_vm5, %v685_v47, inf }
 0x61b   : > { %688 = vmin.xlane.f32.xlu0 %v687_v49 }
 0x6a7   : > { %v692_v50 = vpop.xlane.xlu1 %691 }
 0x6a8   : > { %vm694_vm15 = vcmp.le.f32.partialorder %v686_v46, %v692_v50  ;;  %v689_v51 = vpop.xlane.xlu0 %688 }
 0x6a9   : > { %v696_v52 = vsel %vm694_vm15, %v5153_v41, 2  ;;  %vm693_vm3 = vcmp.le.f32.partialorder %v685_v47, %v689_v51 }
 0x6aa   : > { %v712_v53 = vsel %vm459_vm5, %v696_v52, 2147483647  ;;  %v695_v54 = vsel %vm693_vm3, %v5153_v41, 2 }
 0x6ab   : > { %v697_v55 = vsel %vm459_vm5, %v695_v54, 2147483647  ;;  %v714_v56 = vshra.s32 %v712_v53, 16  ;;  %v713_v60 = vand.u32 65535, %v712_v53 }
 0x6ac   : > { %v699_v57 = vshra.s32 %v697_v55, 16  ;;  %v698_v61 = vand.u32 65535, %v697_v55 }
 0x6ad   : > { %v716_v58 = vcvt.s32.f32 %v714_v56  ;;  %v715_v63 = vcvt.s32.f32 %v713_v60 }
 0x6ae   : > { %v701_v59 = vcvt.s32.f32 %v699_v57  ;;  %v700_v1 = vcvt.s32.f32 %v698_v61 }
 0x6af   : > { %717 = vmin.xlane.f32.xlu1 %v716_v58 }
 0x6b0   : > { %702 = vmin.xlane.f32.xlu0 %v701_v59 }
 0x73c   : > { %v718_v62 = vpop.xlane.xlu1 %717 }
 0x73d   : > { %v703_v0 = vpop.xlane.xlu0 %702  ;;  %vm719_vm6 = vcmp.eq.f32.partialorder %v716_v58, %v718_v62  ;;  %v724_v6 = vcvt.f32.s32 %v718_v62 }
 0x73e   : > { %v720_v2 = vsel %vm719_vm6, %v715_v63, inf  ;;  %vm704_vm7 = vcmp.eq.f32.partialorder %v701_v59, %v703_v0  ;;  %v709_v7 = vcvt.f32.s32 %v703_v0 }
 0x73f   : > { %721 = vmin.xlane.f32.xlu1 %v720_v2  ;;  %v705_v5 = vsel %vm704_vm7, %v700_v1, inf  ;;  %v725_v9 = vshll.u32 %v724_v6, 16 }
 0x740   : > { %706 = vmin.xlane.f32.xlu0 %v705_v5  ;;  %v710_v15 = vshll.u32 %v709_v7, 16 }
 0x7cc   : > { %v722_v8 = vpop.xlane.xlu1 %721 }
 0x7cd   : > { %v723_v12 = vcvt.f32.s32 %v722_v8  ;;  %v707_v13 = vpop.xlane.xlu0 %706 }
 0x7ce   : > { %v708_v16 = vcvt.f32.s32 %v707_v13 }
 0x7cf   : > { %v726_v17 = vadd.s32 %v725_v9, %v723_v12 }
 0x7d0   : > { %v711_v19 = vadd.s32 %v710_v15, %v708_v16 }
 0x7d1   : > { %vm728_vm8 = vcmp.eq.s32.totalorder %v5153_v41, %v726_v17 }
 0x7d2   : > { %v4223_v20 = vsel %vm728_vm8, 1.0, %v5058_v4  ;;  %vm727_vm9 = vcmp.eq.s32.totalorder %v5153_v41, %v711_v19 }
 0x7d3   : > { %v734_v21 = vsel %vm459_vm5, %v4223_v20, 0.0  ;;  %v4222_v22 = vsel %vm727_vm9, 1.0, %v5058_v4  ;;  %vm4847_vm10 = vmpackc.low %vm728_vm8, %vm727_vm9 }
 0x7d4   : > { %v733_v23 = vsel %vm459_vm5, %v4222_v22, 0.0  ;;  %4848 = vmatpush3.bf16.msk.msra.mxu0 %vm4847_vm10, %v5059_v14 }
 0x7d5   : > { %v735_v24 = vadd.f32 %v734_v21, %v733_v23  ;;  %4849 = vmatprep.subr.bf16.mxu0 %v5056_v3 }
 0x7d7   : > { %4544 = vmatmul.mubr.msk.f32.vlgmr.msra.gmra.mrb[6].mxu0 %vm515_vm13, %v5131_v18  ;;  %v736_v25 = vrot.slane %v735_v24, 4 }
 0x7d8   : > { %4555 = vmatprep.mubr.msk.f32.mxu0 %vm5057_vm2, %v5058_v4 }
 0x7d9   : > { %v737_v27 = vadd.f32 %v736_v25, %v735_v24 }
 0x7db   : > { %v738_v28 = vrot.slane %v737_v27, 2 }
 0x7dd   : > { %v739_v30 = vadd.f32 %v738_v28, %v737_v27 }
 0x7df   : > { %v740_v32 = vrot.slane %v739_v30, 1 }
 0x7e1   : > { %v741_v33 = vadd.f32 %v740_v32, %v739_v30 }
 0x7e3   : > { %v813_v34 = vmax.f32 %v741_v33, 1.0  ;;  %vm812_vm11 = vcmp.gt.f32.partialorder %v741_v33, 0.5 }
 0x7e5   : > { %5014 = vrcp.f32 %v813_v34 }
 0x7ef   : > { %v5015_v35 = vpop.eup %5014 }
 0x8aa   : > { %v808_v36 = vpop.f32.mrb[6].mxu0 }
 0x8ab   : > { %v815_v37 = vmul.f32 %v5015_v35, %v808_v36  ;;  %v4545_v38 = vpop.f32.mrb[7].mxu0 }
 0x8ad   : > { %v5206_v39 = vsel %vm812_vm11, %v815_v37, %v5172_v29 }
 0x8ae   : > { %4546 = vmatprep.subr.msk.mxu1 %vm195_vm0, %v5206_v39  ;;  %v819_v40 = vmul.f32 %v5206_v39, %v5206_v39 }
 0x8af   : > { %4547 = vmatpush3.msk.msra.mxu1 %vm195_vm0, %v5206_v39 }
 0x8b0   : > { %4549 = vmatmul.mubr.msk.f32.vlgmr.msra.gmra.mrb[4].mxu1 %vm188_vm1, %v5109_v10  ;;  %v820_v42 = vsel %vm367_vm4, %v819_v40, 0.0 }
 0x8b1   : > { %4560 = vmatprep.mubr.msk.f32.mxu1 %vm188_vm1, %v5111_v11  ;;  %v821_v43 = vrot.slane %v820_v42, 4 }
 0x8b3   : > { %v822_v29 = vadd.f32 %v821_v43, %v820_v42 }
 0x8b5   : > { %v823_v44 = vrot.slane %v822_v29, 2 }
 0x8b7   : > { %v824_v45 = vadd.f32 %v823_v44, %v822_v29 }
 0x8b9   : > { %v825_v46 = vrot.slane %v824_v45, 1 }
 0x8bb   : > { %v826_v52 = vadd.f32 %v825_v46, %v824_v45 }
 0x983   : > { %v4550_v47 = vpop.f32.mrb[4].mxu1 }
 0x984   : > { %v906_v48 = vmul.f32 2.0, %v4550_v47  ;;  %v896_v49 = vpop.f32.mrb[5].mxu1 }
 0x985   : > { %v905_v50 = vmul.f32 2.0, %v896_v49 }
 0x986   : > { %v908_v51 = vsub.f32 %v5147_v31, %v906_v48 }
 0x987   : > { %v907_v53 = vsub.f32 %v5145_v26, %v905_v50 }
 0x988   : > { %v910_v54 = vadd.f32 %v908_v51, %v826_v52 }
 0x989   : > { %v909_v55 = vadd.f32 %v907_v53, %v826_v52 }
 0x98a   : > { %v914_v56 = vsel %vm459_vm5, %v910_v54, inf }
 0x98b   : > { %915 = vmin.xlane.f32.xlu1 %v914_v56  ;;  %v911_v57 = vsel %vm459_vm5, %v909_v55, inf }
 0x98c   : > { %912 = vmin.xlane.f32.xlu0 %v911_v57 }
 0xa18   : > { %v916_v58 = vpop.xlane.xlu1 %915 }
 0xa19   : > { %vm918_vm12 = vcmp.le.f32.partialorder %v910_v54, %v916_v58  ;;  %v913_v59 = vpop.xlane.xlu0 %912 }
 0xa1a   : > { %v920_v60 = vsel %vm918_vm12, %v5153_v41, 2  ;;  %vm917_vm14 = vcmp.le.f32.partialorder %v909_v55, %v913_v59 }
 0xa1b   : > { %v936_v61 = vsel %vm459_vm5, %v920_v60, 2147483647  ;;  %v919_v62 = vsel %vm917_vm14, %v5153_v41, 2 }
 0xa1c   : > { %v921_v63 = vsel %vm459_vm5, %v919_v62, 2147483647  ;;  %v938_v0 = vshra.s32 %v936_v61, 16  ;;  %v937_v6 = vand.u32 65535, %v936_v61 }
 0xa1d   : > { %v923_v1 = vshra.s32 %v921_v63, 16  ;;  %v922_v7 = vand.u32 65535, %v921_v63 }
 0xa1e   : > { %v940_v2 = vcvt.s32.f32 %v938_v0  ;;  %v939_v9 = vcvt.s32.f32 %v937_v6 }
 0xa1f   : > { %v925_v5 = vcvt.s32.f32 %v923_v1  ;;  %v924_v13 = vcvt.s32.f32 %v922_v7 }
 0xa20   : > { %941 = vmin.xlane.f32.xlu1 %v940_v2 }
 0xa21   : > { %926 = vmin.xlane.f32.xlu0 %v925_v5 }
 0xaad   : > { %v942_v8 = vpop.xlane.xlu1 %941 }
 0xaae   : > { %v927_v12 = vpop.xlane.xlu0 %926  ;;  %vm943_vm15 = vcmp.eq.f32.partialorder %v940_v2, %v942_v8  ;;  %v948_v17 = vcvt.f32.s32 %v942_v8 }
 0xaaf   : > { %v944_v15 = vsel %vm943_vm15, %v939_v9, inf  ;;  %vm928_vm3 = vcmp.eq.f32.partialorder %v925_v5, %v927_v12  ;;  %v933_v19 = vcvt.f32.s32 %v927_v12 }
 0xab0   : > { %945 = vmin.xlane.f32.xlu1 %v944_v15  ;;  %v929_v16 = vsel %vm928_vm3, %v924_v13, inf  ;;  %v949_v21 = vshll.u32 %v948_v17, 16 }
 0xab1   : > { %930 = vmin.xlane.f32.xlu0 %v929_v16  ;;  %v934_v24 = vshll.u32 %v933_v19, 16 }
 0xb3d   : > { %v946_v20 = vpop.xlane.xlu1 %945 }
 0xb3e   : > { %v947_v22 = vcvt.f32.s32 %v946_v20  ;;  %v931_v23 = vpop.xlane.xlu0 %930 }
 0xb3f   : > { %v932_v25 = vcvt.f32.s32 %v931_v23 }
 0xb40   : > { %v950_v27 = vadd.s32 %v949_v21, %v947_v22 }
 0xb41   : > { %v935_v28 = vadd.s32 %v934_v24, %v932_v25 }
 0xb42   : > { %vm952_vm6 = vcmp.eq.s32.totalorder %v5153_v41, %v950_v27 }
 0xb43   : > { %v4231_v30 = vsel %vm952_vm6, 1.0, %v5058_v4  ;;  %vm951_vm7 = vcmp.eq.s32.totalorder %v5153_v41, %v935_v28 }
 0xb44   : > { %v958_v32 = vsel %vm459_vm5, %v4231_v30, 0.0  ;;  %v4230_v33 = vsel %vm951_vm7, 1.0, %v5058_v4  ;;  %vm4850_vm8 = vmpackc.low %vm952_vm6, %vm951_vm7 }
 0xb45   : > { %v957_v34 = vsel %vm459_vm5, %v4230_v33, 0.0  ;;  %4851 = vmatpush3.bf16.msk.msra.mxu0 %vm4850_vm8, %v5059_v14 }
 0xb46   : > { %v959_v35 = vadd.f32 %v958_v32, %v957_v34  ;;  %4852 = vmatprep.subr.bf16.mxu0 %v5056_v3 }
 0xb48   : > { %4556 = vmatmul.mubr.msk.f32.vlgmr.msra.gmra.mrb[8].mxu0 %vm515_vm13, %v5131_v18  ;;  %v960_v36 = vrot.slane %v959_v35, 4 }
 0xb49   : > { %4567 = vmatprep.mubr.msk.f32.mxu0 %vm5057_vm2, %v5058_v4 }
 0xb4a   : > { %v961_v37 = vadd.f32 %v960_v36, %v959_v35 }
 0xb4c   : > { %v962_v38 = vrot.slane %v961_v37, 2 }
 0xb4e   : > { %v963_v40 = vadd.f32 %v962_v38, %v961_v37 }
 0xb50   : > { %v964_v42 = vrot.slane %v963_v40, 1 }
 0xb52   : > { %v965_v43 = vadd.f32 %v964_v42, %v963_v40 }
 0xb54   : > { %v1037_v29 = vmax.f32 %v965_v43, 1.0  ;;  %vm1036_vm9 = vcmp.gt.f32.partialorder %v965_v43, 0.5 }
 0xb56   : > { %5016 = vrcp.f32 %v1037_v29 }
 0xb60   : > { %v5017_v44 = vpop.eup %5016 }
 0xc1b   : > { %v1032_v45 = vpop.f32.mrb[8].mxu0 }
 0xc1c   : > { %v1039_v46 = vmul.f32 %v5017_v44, %v1032_v45  ;;  %v4557_v47 = vpop.f32.mrb[9].mxu0 }
 0xc1e   : > { %v5240_v48 = vsel %vm1036_vm9, %v1039_v46, %v5206_v39 }
 0xc1f   : > { %4558 = vmatprep.subr.msk.mxu1 %vm195_vm0, %v5240_v48  ;;  %v1043_v49 = vmul.f32 %v5240_v48, %v5240_v48 }
 0xc20   : > { %4559 = vmatpush3.msk.msra.mxu1 %vm195_vm0, %v5240_v48 }
 0xc21   : > { %4561 = vmatmul.mubr.msk.f32.vlgmr.msra.gmra.mrb[6].mxu1 %vm188_vm1, %v5109_v10  ;;  %v1044_v50 = vsel %vm367_vm4, %v1043_v49, 0.0 }
 0xc22   : > { %4572 = vmatprep.mubr.msk.f32.mxu1 %vm188_vm1, %v5111_v11  ;;  %v1045_v51 = vrot.slane %v1044_v50, 4 }
 0xc24   : > { %v1046_v39 = vadd.f32 %v1045_v51, %v1044_v50 }
 0xc26   : > { %v1047_v52 = vrot.slane %v1046_v39, 2 }
 0xc28   : > { %v1048_v53 = vadd.f32 %v1047_v52, %v1046_v39 }
 0xc2a   : > { %v1049_v54 = vrot.slane %v1048_v53, 1 }
 0xc2c   : > { %v1050_v60 = vadd.f32 %v1049_v54, %v1048_v53 }
 0xcf4   : > { %v4562_v55 = vpop.f32.mrb[6].mxu1 }
 0xcf5   : > { %v1130_v56 = vmul.f32 2.0, %v4562_v55  ;;  %v1120_v57 = vpop.f32.mrb[7].mxu1 }
 0xcf6   : > { %v1129_v58 = vmul.f32 2.0, %v1120_v57 }
 0xcf7   : > { %v1132_v59 = vsub.f32 %v5147_v31, %v1130_v56 }
 0xcf8   : > { %v1131_v61 = vsub.f32 %v5145_v26, %v1129_v58 }
 0xcf9   : > { %v1134_v62 = vadd.f32 %v1132_v59, %v1050_v60 }
 0xcfa   : > { %v1133_v63 = vadd.f32 %v1131_v61, %v1050_v60 }
 0xcfb   : > { %v1138_v0 = vsel %vm459_vm5, %v1134_v62, inf }
 0xcfc   : > { %1139 = vmin.xlane.f32.xlu1 %v1138_v0  ;;  %v1135_v1 = vsel %vm459_vm5, %v1133_v63, inf }
 0xcfd   : > { %1136 = vmin.xlane.f32.xlu0 %v1135_v1 }
 0xd89   : > { %v1140_v2 = vpop.xlane.xlu1 %1139 }
 0xd8a   : > { %vm1142_vm10 = vcmp.le.f32.partialorder %v1134_v62, %v1140_v2  ;;  %v1137_v5 = vpop.xlane.xlu0 %1136 }
 0xd8b   : > { %v1144_v6 = vsel %vm1142_vm10, %v5153_v41, 2  ;;  %vm1141_vm11 = vcmp.le.f32.partialorder %v1133_v63, %v1137_v5 }
 0xd8c   : > { %v1160_v7 = vsel %vm459_vm5, %v1144_v6, 2147483647  ;;  %v1143_v8 = vsel %vm1141_vm11, %v5153_v41, 2 }
 0xd8d   : > { %v1145_v9 = vsel %vm459_vm5, %v1143_v8, 2147483647  ;;  %v1162_v12 = vshra.s32 %v1160_v7, 16  ;;  %v1161_v17 = vand.u32 65535, %v1160_v7 }
 0xd8e   : > { %v1147_v13 = vshra.s32 %v1145_v9, 16  ;;  %v1146_v19 = vand.u32 65535, %v1145_v9 }
 0xd8f   : > { %v1164_v15 = vcvt.s32.f32 %v1162_v12  ;;  %v1163_v21 = vcvt.s32.f32 %v1161_v17 }
 0xd90   : > { %v1149_v16 = vcvt.s32.f32 %v1147_v13  ;;  %v1148_v23 = vcvt.s32.f32 %v1146_v19 }
 0xd91   : > { %1165 = vmin.xlane.f32.xlu1 %v1164_v15 }
 0xd92   : > { %1150 = vmin.xlane.f32.xlu0 %v1149_v16 }
 0xe1e   : > { %v1166_v20 = vpop.xlane.xlu1 %1165 }
 0xe1f   : > { %v1151_v22 = vpop.xlane.xlu0 %1150  ;;  %vm1167_vm12 = vcmp.eq.f32.partialorder %v1164_v15, %v1166_v20  ;;  %v1172_v27 = vcvt.f32.s32 %v1166_v20 }
 0xe20   : > { %v1168_v24 = vsel %vm1167_vm12, %v1163_v21, inf  ;;  %vm1152_vm14 = vcmp.eq.f32.partialorder %v1149_v16, %v1151_v22  ;;  %v1157_v28 = vcvt.f32.s32 %v1151_v22 }
 0xe21   : > { %1169 = vmin.xlane.f32.xlu1 %v1168_v24  ;;  %v1153_v25 = vsel %vm1152_vm14, %v1148_v23, inf  ;;  %v1173_v32 = vshll.u32 %v1172_v27, 16 }
 0xe22   : > { %1154 = vmin.xlane.f32.xlu0 %v1153_v25  ;;  %v1158_v35 = vshll.u32 %v1157_v28, 16 }
 0xeae   : > { %v1170_v30 = vpop.xlane.xlu1 %1169 }
 0xeaf   : > { %v1171_v33 = vcvt.f32.s32 %v1170_v30  ;;  %v1155_v34 = vpop.xlane.xlu0 %1154 }
 0xeb0   : > { %v1156_v36 = vcvt.f32.s32 %v1155_v34 }
 0xeb1   : > { %v1174_v37 = vadd.s32 %v1173_v32, %v1171_v33 }
 0xeb2   : > { %v1159_v38 = vadd.s32 %v1158_v35, %v1156_v36 }
 0xeb3   : > { %vm1176_vm15 = vcmp.eq.s32.totalorder %v5153_v41, %v1174_v37 }
 0xeb4   : > { %v4239_v40 = vsel %vm1176_vm15, 1.0, %v5058_v4  ;;  %vm1175_vm3 = vcmp.eq.s32.totalorder %v5153_v41, %v1159_v38 }
 0xeb5   : > { %v1182_v42 = vsel %vm459_vm5, %v4239_v40, 0.0  ;;  %v4238_v43 = vsel %vm1175_vm3, 1.0, %v5058_v4  ;;  %vm4853_vm6 = vmpackc.low %vm1176_vm15, %vm1175_vm3 }
 0xeb6   : > { %v1181_v29 = vsel %vm459_vm5, %v4238_v43, 0.0  ;;  %4854 = vmatpush3.bf16.msk.msra.mxu0 %vm4853_vm6, %v5059_v14 }
 0xeb7   : > { %v1183_v44 = vadd.f32 %v1182_v42, %v1181_v29  ;;  %4855 = vmatprep.subr.bf16.mxu0 %v5056_v3 }
 0xeb9   : > { %4568 = vmatmul.mubr.msk.f32.vlgmr.msra.gmra.mrb[10].mxu0 %vm515_vm13, %v5131_v18  ;;  %v1184_v45 = vrot.slane %v1183_v44, 4 }
 0xeba   : > { %4579 = vmatprep.mubr.msk.f32.mxu0 %vm5057_vm2, %v5058_v4 }
 0xebb   : > { %v1185_v46 = vadd.f32 %v1184_v45, %v1183_v44 }
 0xebd   : > { %v1186_v47 = vrot.slane %v1185_v46, 2 }
 0xebf   : > { %v1187_v49 = vadd.f32 %v1186_v47, %v1185_v46 }
 0xec1   : > { %v1188_v50 = vrot.slane %v1187_v49, 1 }
 0xec3   : > { %v1189_v51 = vadd.f32 %v1188_v50, %v1187_v49 }
 0xec5   : > { %v1261_v39 = vmax.f32 %v1189_v51, 1.0  ;;  %vm1260_vm7 = vcmp.gt.f32.partialorder %v1189_v51, 0.5 }
 0xec7   : > { %5018 = vrcp.f32 %v1261_v39 }
 0xed1   : > { %v5019_v52 = vpop.eup %5018 }
 0xf8c   : > { %v1256_v53 = vpop.f32.mrb[10].mxu0 }
 0xf8d   : > { %v1263_v54 = vmul.f32 %v5019_v52, %v1256_v53  ;;  %v4569_v55 = vpop.f32.mrb[11].mxu0 }
 0xf8f   : > { %v5274_v56 = vsel %vm1260_vm7, %v1263_v54, %v5240_v48 }
 0xf90   : > { %4570 = vmatprep.subr.msk.mxu1 %vm195_vm0, %v5274_v56  ;;  %v1267_v57 = vmul.f32 %v5274_v56, %v5274_v56 }
 0xf91   : > { %4571 = vmatpush3.msk.msra.mxu1 %vm195_vm0, %v5274_v56 }
 0xf92   : > { %4573 = vmatmul.mubr.msk.f32.vlgmr.msra.gmra.mrb[8].mxu1 %vm188_vm1, %v5109_v10  ;;  %v1268_v58 = vsel %vm367_vm4, %v1267_v57, 0.0 }
 0xf93   : > { %4584 = vmatprep.mubr.msk.f32.mxu1 %vm188_vm1, %v5111_v11  ;;  %v1269_v59 = vrot.slane %v1268_v58, 4 }
 0xf95   : > { %v1270_v48 = vadd.f32 %v1269_v59, %v1268_v58 }
 0xf97   : > { %v1271_v60 = vrot.slane %v1270_v48, 2 }
 0xf99   : > { %v1272_v61 = vadd.f32 %v1271_v60, %v1270_v48 }
 0xf9b   : > { %v1273_v62 = vrot.slane %v1272_v61, 1 }
 0xf9d   : > { %v1274_v6 = vadd.f32 %v1273_v62, %v1272_v61 }
0x1065   : > { %v4574_v63 = vpop.f32.mrb[8].mxu1 }
0x1066   : > { %v1354_v0 = vmul.f32 2.0, %v4574_v63  ;;  %v1344_v1 = vpop.f32.mrb[9].mxu1 }
0x1067   : > { %v1353_v2 = vmul.f32 2.0, %v1344_v1 }
0x1068   : > { %v1356_v5 = vsub.f32 %v5147_v31, %v1354_v0 }
0x1069   : > { %v1355_v7 = vsub.f32 %v5145_v26, %v1353_v2 }
0x106a   : > { %v1358_v8 = vadd.f32 %v1356_v5, %v1274_v6 }
0x106b   : > { %v1357_v9 = vadd.f32 %v1355_v7, %v1274_v6 }
0x106c   : > { %v1362_v12 = vsel %vm459_vm5, %v1358_v8, inf }
0x106d   : > { %1363 = vmin.xlane.f32.xlu1 %v1362_v12  ;;  %v1359_v13 = vsel %vm459_vm5, %v1357_v9, inf }
0x106e   : > { %1360 = vmin.xlane.f32.xlu0 %v1359_v13 }
0x10fa   : > { %v1364_v15 = vpop.xlane.xlu1 %1363 }
0x10fb   : > { %vm1366_vm8 = vcmp.le.f32.partialorder %v1358_v8, %v1364_v15  ;;  %v1361_v16 = vpop.xlane.xlu0 %1360 }
0x10fc   : > { %v1368_v17 = vsel %vm1366_vm8, %v5153_v41, 2  ;;  %vm1365_vm9 = vcmp.le.f32.partialorder %v1357_v9, %v1361_v16 }
0x10fd   : > { %v1384_v19 = vsel %vm459_vm5, %v1368_v17, 2147483647  ;;  %v1367_v20 = vsel %vm1365_vm9, %v5153_v41, 2 }
0x10fe   : > { %v1369_v21 = vsel %vm459_vm5, %v1367_v20, 2147483647  ;;  %v1386_v22 = vshra.s32 %v1384_v19, 16  ;;  %v1385_v27 = vand.u32 65535, %v1384_v19 }
0x10ff   : > { %v1371_v23 = vshra.s32 %v1369_v21, 16  ;;  %v1370_v28 = vand.u32 65535, %v1369_v21 }
0x1100   : > { %v1388_v24 = vcvt.s32.f32 %v1386_v22  ;;  %v1387_v32 = vcvt.s32.f32 %v1385_v27 }
0x1101   : > { %v1373_v25 = vcvt.s32.f32 %v1371_v23  ;;  %v1372_v34 = vcvt.s32.f32 %v1370_v28 }
0x1102   : > { %1389 = vmin.xlane.f32.xlu1 %v1388_v24 }
0x1103   : > { %1374 = vmin.xlane.f32.xlu0 %v1373_v25 }
0x118f   : > { %v1390_v30 = vpop.xlane.xlu1 %1389 }
0x1190   : > { %v1375_v33 = vpop.xlane.xlu0 %1374  ;;  %vm1391_vm10 = vcmp.eq.f32.partialorder %v1388_v24, %v1390_v30  ;;  %v1396_v37 = vcvt.f32.s32 %v1390_v30 }
0x1191   : > { %v1392_v35 = vsel %vm1391_vm10, %v1387_v32, inf  ;;  %vm1376_vm11 = vcmp.eq.f32.partialorder %v1373_v25, %v1375_v33  ;;  %v1381_v38 = vcvt.f32.s32 %v1375_v33 }
0x1192   : > { %1393 = vmin.xlane.f32.xlu1 %v1392_v35  ;;  %v1377_v36 = vsel %vm1376_vm11, %v1372_v34, inf  ;;  %v1397_v42 = vshll.u32 %v1396_v37, 16 }
0x1193   : > { %1378 = vmin.xlane.f32.xlu0 %v1377_v36  ;;  %v1382_v44 = vshll.u32 %v1381_v38, 16 }
0x121f   : > { %v1394_v40 = vpop.xlane.xlu1 %1393 }
0x1220   : > { %v1395_v43 = vcvt.f32.s32 %v1394_v40  ;;  %v1379_v29 = vpop.xlane.xlu0 %1378 }
0x1221   : > { %v1380_v45 = vcvt.f32.s32 %v1379_v29 }
0x1222   : > { %v1398_v46 = vadd.s32 %v1397_v42, %v1395_v43 }
0x1223   : > { %v1383_v47 = vadd.s32 %v1382_v44, %v1380_v45 }
0x1224   : > { %vm1400_vm12 = vcmp.eq.s32.totalorder %v5153_v41, %v1398_v46 }
0x1225   : > { %v4247_v49 = vsel %vm1400_vm12, 1.0, %v5058_v4  ;;  %vm1399_vm14 = vcmp.eq.s32.totalorder %v5153_v41, %v1383_v47 }
0x1226   : > { %v1406_v50 = vsel %vm459_vm5, %v4247_v49, 0.0  ;;  %v4246_v51 = vsel %vm1399_vm14, 1.0, %v5058_v4  ;;  %vm4856_vm15 = vmpackc.low %vm1400_vm12, %vm1399_vm14 }
0x1227   : > { %v1405_v39 = vsel %vm459_vm5, %v4246_v51, 0.0  ;;  %4857 = vmatpush3.bf16.msk.msra.mxu0 %vm4856_vm15, %v5059_v14 }
0x1228   : > { %v1407_v52 = vadd.f32 %v1406_v50, %v1405_v39  ;;  %4858 = vmatprep.subr.bf16.mxu0 %v5056_v3 }
0x122a   : > { %4580 = vmatmul.mubr.msk.f32.vlgmr.msra.gmra.mrb[12].mxu0 %vm515_vm13, %v5131_v18  ;;  %v1408_v53 = vrot.slane %v1407_v52, 4 }
0x122b   : > { %4591 = vmatprep.mubr.msk.f32.mxu0 %vm5057_vm2, %v5058_v4 }
0x122c   : > { %v1409_v54 = vadd.f32 %v1408_v53, %v1407_v52 }
0x122e   : > { %v1410_v55 = vrot.slane %v1409_v54, 2 }
0x1230   : > { %v1411_v57 = vadd.f32 %v1410_v55, %v1409_v54 }
0x1232   : > { %v1412_v58 = vrot.slane %v1411_v57, 1 }
0x1234   : > { %v1413_v59 = vadd.f32 %v1412_v58, %v1411_v57 }
0x1236   : > { %v1485_v48 = vmax.f32 %v1413_v59, 1.0  ;;  %vm1484_vm3 = vcmp.gt.f32.partialorder %v1413_v59, 0.5 }
0x1238   : > { %5020 = vrcp.f32 %v1485_v48 }
0x1242   : > { %v5021_v60 = vpop.eup %5020 }
0x12fd   : > { %v1480_v61 = vpop.f32.mrb[12].mxu0 }
0x12fe   : > { %v1487_v62 = vmul.f32 %v5021_v60, %v1480_v61  ;;  %v4581_v63 = vpop.f32.mrb[13].mxu0 }
0x1300   : > { %v5308_v0 = vsel %vm1484_vm3, %v1487_v62, %v5274_v56 }
0x1301   : > { %4582 = vmatprep.subr.msk.mxu1 %vm195_vm0, %v5308_v0  ;;  %v1491_v1 = vmul.f32 %v5308_v0, %v5308_v0 }
0x1302   : > { %4583 = vmatpush3.msk.msra.mxu1 %vm195_vm0, %v5308_v0 }
0x1303   : > { %4585 = vmatmul.mubr.msk.f32.vlgmr.msra.gmra.mrb[10].mxu1 %vm188_vm1, %v5109_v10  ;;  %v1492_v2 = vsel %vm367_vm4, %v1491_v1, 0.0 }
0x1304   : > { %4596 = vmatprep.mubr.msk.f32.mxu1 %vm188_vm1, %v5111_v11  ;;  %v1493_v5 = vrot.slane %v1492_v2, 4 }
0x1306   : > { %v1494_v56 = vadd.f32 %v1493_v5, %v1492_v2 }
0x1308   : > { %v1495_v6 = vrot.slane %v1494_v56, 2 }
0x130a   : > { %v1496_v7 = vadd.f32 %v1495_v6, %v1494_v56 }
0x130c   : > { %v1497_v8 = vrot.slane %v1496_v7, 1 }
0x130e   : > { %v1498_v17 = vadd.f32 %v1497_v8, %v1496_v7 }
0x13d6   : > { %v4586_v9 = vpop.f32.mrb[10].mxu1 }
0x13d7   : > { %v1578_v12 = vmul.f32 2.0, %v4586_v9  ;;  %v1568_v13 = vpop.f32.mrb[11].mxu1 }
0x13d8   : > { %v1577_v15 = vmul.f32 2.0, %v1568_v13 }
0x13d9   : > { %v1580_v16 = vsub.f32 %v5147_v31, %v1578_v12 }
0x13da   : > { %v1579_v19 = vsub.f32 %v5145_v26, %v1577_v15 }
0x13db   : > { %v1582_v20 = vadd.f32 %v1580_v16, %v1498_v17 }
0x13dc   : > { %v1581_v21 = vadd.f32 %v1579_v19, %v1498_v17 }
0x13dd   : > { %v1586_v22 = vsel %vm459_vm5, %v1582_v20, inf }
0x13de   : > { %1587 = vmin.xlane.f32.xlu1 %v1586_v22  ;;  %v1583_v23 = vsel %vm459_vm5, %v1581_v21, inf }
0x13df   : > { %1584 = vmin.xlane.f32.xlu0 %v1583_v23 }
0x146b   : > { %v1588_v24 = vpop.xlane.xlu1 %1587 }
0x146c   : > { %vm1590_vm6 = vcmp.le.f32.partialorder %v1582_v20, %v1588_v24  ;;  %v1585_v25 = vpop.xlane.xlu0 %1584 }
0x146d   : > { %v1592_v27 = vsel %vm1590_vm6, %v5153_v41, 2  ;;  %vm1589_vm7 = vcmp.le.f32.partialorder %v1581_v21, %v1585_v25 }
0x146e   : > { %v1608_v28 = vsel %vm459_vm5, %v1592_v27, 2147483647  ;;  %v1591_v30 = vsel %vm1589_vm7, %v5153_v41, 2 }
0x146f   : > { %v1593_v32 = vsel %vm459_vm5, %v1591_v30, 2147483647  ;;  %v1610_v33 = vshra.s32 %v1608_v28, 16  ;;  %v1609_v37 = vand.u32 65535, %v1608_v28 }
0x1470   : > { %v1595_v34 = vshra.s32 %v1593_v32, 16  ;;  %v1594_v38 = vand.u32 65535, %v1593_v32 }
0x1471   : > { %v1612_v35 = vcvt.s32.f32 %v1610_v33  ;;  %v1611_v42 = vcvt.s32.f32 %v1609_v37 }
0x1472   : > { %v1597_v36 = vcvt.s32.f32 %v1595_v34  ;;  %v1596_v29 = vcvt.s32.f32 %v1594_v38 }
0x1473   : > { %1613 = vmin.xlane.f32.xlu1 %v1612_v35 }
0x1474   : > { %1598 = vmin.xlane.f32.xlu0 %v1597_v36 }
0x1500   : > { %v1614_v40 = vpop.xlane.xlu1 %1613 }
0x1501   : > { %v1599_v43 = vpop.xlane.xlu0 %1598  ;;  %vm1615_vm8 = vcmp.eq.f32.partialorder %v1612_v35, %v1614_v40  ;;  %v1620_v46 = vcvt.f32.s32 %v1614_v40 }
0x1502   : > { %v1616_v44 = vsel %vm1615_vm8, %v1611_v42, inf  ;;  %vm1600_vm9 = vcmp.eq.f32.partialorder %v1597_v36, %v1599_v43  ;;  %v1605_v47 = vcvt.f32.s32 %v1599_v43 }
0x1503   : > { %1617 = vmin.xlane.f32.xlu1 %v1616_v44  ;;  %v1601_v45 = vsel %vm1600_vm9, %v1596_v29, inf  ;;  %v1621_v50 = vshll.u32 %v1620_v46, 16 }
0x1504   : > { %1602 = vmin.xlane.f32.xlu0 %v1601_v45  ;;  %v1606_v52 = vshll.u32 %v1605_v47, 16 }
0x1590   : > { %v1618_v49 = vpop.xlane.xlu1 %1617 }
0x1591   : > { %v1619_v51 = vcvt.f32.s32 %v1618_v49  ;;  %v1603_v39 = vpop.xlane.xlu0 %1602 }
0x1592   : > { %v1604_v53 = vcvt.f32.s32 %v1603_v39 }
0x1593   : > { %v1622_v54 = vadd.s32 %v1621_v50, %v1619_v51 }
0x1594   : > { %v1607_v55 = vadd.s32 %v1606_v52, %v1604_v53 }
0x1595   : > { %vm1624_vm10 = vcmp.eq.s32.totalorder %v5153_v41, %v1622_v54 }
0x1596   : > { %v4255_v57 = vsel %vm1624_vm10, 1.0, %v5058_v4  ;;  %vm1623_vm11 = vcmp.eq.s32.totalorder %v5153_v41, %v1607_v55 }
0x1597   : > { %v1630_v58 = vsel %vm459_vm5, %v4255_v57, 0.0  ;;  %v4254_v59 = vsel %vm1623_vm11, 1.0, %v5058_v4  ;;  %vm4859_vm12 = vmpackc.low %vm1624_vm10, %vm1623_vm11 }
0x1598   : > { %v1629_v48 = vsel %vm459_vm5, %v4254_v59, 0.0  ;;  %4860 = vmatpush3.bf16.msk.msra.mxu0 %vm4859_vm12, %v5059_v14 }
0x1599   : > { %v1631_v60 = vadd.f32 %v1630_v58, %v1629_v48  ;;  %4861 = vmatprep.subr.bf16.mxu0 %v5056_v3 }
0x159b   : > { %4592 = vmatmul.mubr.msk.f32.vlgmr.msra.gmra.mrb[14].mxu0 %vm515_vm13, %v5131_v18  ;;  %v1632_v61 = vrot.slane %v1631_v60, 4 }
0x159c   : > { %4603 = vmatprep.mubr.msk.f32.mxu0 %vm5057_vm2, %v5058_v4 }
0x159d   : > { %v1633_v62 = vadd.f32 %v1632_v61, %v1631_v60 }
0x159f   : > { %v1634_v63 = vrot.slane %v1633_v62, 2 }
0x15a1   : > { %v1635_v1 = vadd.f32 %v1634_v63, %v1633_v62 }
0x15a3   : > { %v1636_v2 = vrot.slane %v1635_v1, 1 }
0x15a5   : > { %v1637_v5 = vadd.f32 %v1636_v2, %v1635_v1 }
0x15a7   : > { %v1709_v56 = vmax.f32 %v1637_v5, 1.0  ;;  %vm1708_vm14 = vcmp.gt.f32.partialorder %v1637_v5, 0.5 }
0x15a9   : > { %5022 = vrcp.f32 %v1709_v56 }
0x15b3   : > { %v5023_v6 = vpop.eup %5022 }
0x166e   : > { %v1704_v7 = vpop.f32.mrb[14].mxu0 }
0x166f   : > { %v1711_v8 = vmul.f32 %v5023_v6, %v1704_v7  ;;  %v4593_v9 = vpop.f32.mrb[15].mxu0 }
0x1671   : > { %v5342_v12 = vsel %vm1708_vm14, %v1711_v8, %v5308_v0 }
0x1672   : > { %4594 = vmatprep.subr.msk.mxu1 %vm195_vm0, %v5342_v12  ;;  %v1715_v13 = vmul.f32 %v5342_v12, %v5342_v12 }
0x1673   : > { %4595 = vmatpush3.msk.msra.mxu1 %vm195_vm0, %v5342_v12 }
0x1674   : > { %4597 = vmatmul.mubr.msk.f32.vlgmr.msra.gmra.mrb[12].mxu1 %vm188_vm1, %v5109_v10  ;;  %v1716_v15 = vsel %vm367_vm4, %v1715_v13, 0.0 }
0x1675   : > { %4608 = vmatprep.mubr.msk.f32.mxu1 %vm188_vm1, %v5111_v11  ;;  %v1717_v16 = vrot.slane %v1716_v15, 4 }
0x1677   : > { %v1718_v0 = vadd.f32 %v1717_v16, %v1716_v15 }
0x1679   : > { %v1719_v17 = vrot.slane %v1718_v0, 2 }
0x167b   : > { %v1720_v19 = vadd.f32 %v1719_v17, %v1718_v0 }
0x167d   : > { %v1721_v20 = vrot.slane %v1720_v19, 1 }
0x167f   : > { %v1722_v27 = vadd.f32 %v1721_v20, %v1720_v19 }
0x1747   : > { %v4598_v21 = vpop.f32.mrb[12].mxu1 }
0x1748   : > { %v1802_v22 = vmul.f32 2.0, %v4598_v21  ;;  %v1792_v23 = vpop.f32.mrb[13].mxu1 }
0x1749   : > { %v1801_v24 = vmul.f32 2.0, %v1792_v23 }
0x174a   : > { %v1804_v25 = vsub.f32 %v5147_v31, %v1802_v22 }
0x174b   : > { %v1803_v28 = vsub.f32 %v5145_v26, %v1801_v24 }
0x174c   : > { %v1806_v30 = vadd.f32 %v1804_v25, %v1722_v27 }
0x174d   : > { %v1805_v32 = vadd.f32 %v1803_v28, %v1722_v27 }
0x174e   : > { %v1810_v33 = vsel %vm459_vm5, %v1806_v30, inf }
0x174f   : > { %1811 = vmin.xlane.f32.xlu1 %v1810_v33  ;;  %v1807_v34 = vsel %vm459_vm5, %v1805_v32, inf }
0x1750   : > { %1808 = vmin.xlane.f32.xlu0 %v1807_v34 }
0x17dc   : > { %v1812_v35 = vpop.xlane.xlu1 %1811 }
0x17dd   : > { %vm1814_vm15 = vcmp.le.f32.partialorder %v1806_v30, %v1812_v35  ;;  %v1809_v36 = vpop.xlane.xlu0 %1808 }
0x17de   : > { %v1816_v37 = vsel %vm1814_vm15, %v5153_v41, 2  ;;  %vm1813_vm3 = vcmp.le.f32.partialorder %v1805_v32, %v1809_v36 }
0x17df   : > { %v1832_v38 = vsel %vm459_vm5, %v1816_v37, 2147483647  ;;  %v1815_v40 = vsel %vm1813_vm3, %v5153_v41, 2 }
0x17e0   : > { %v1817_v42 = vsel %vm459_vm5, %v1815_v40, 2147483647  ;;  %v1834_v43 = vshra.s32 %v1832_v38, 16  ;;  %v1833_v46 = vand.u32 65535, %v1832_v38 }
0x17e1   : > { %v1819_v29 = vshra.s32 %v1817_v42, 16  ;;  %v1818_v47 = vand.u32 65535, %v1817_v42 }
0x17e2   : > { %v1836_v44 = vcvt.s32.f32 %v1834_v43  ;;  %v1835_v50 = vcvt.s32.f32 %v1833_v46 }
0x17e3   : > { %v1821_v45 = vcvt.s32.f32 %v1819_v29  ;;  %v1820_v39 = vcvt.s32.f32 %v1818_v47 }
0x17e4   : > { %1837 = vmin.xlane.f32.xlu1 %v1836_v44 }
0x17e5   : > { %1822 = vmin.xlane.f32.xlu0 %v1821_v45 }
0x1871   : > { %v1838_v49 = vpop.xlane.xlu1 %1837 }
0x1872   : > { %v1823_v51 = vpop.xlane.xlu0 %1822  ;;  %vm1839_vm6 = vcmp.eq.f32.partialorder %v1836_v44, %v1838_v49  ;;  %v1844_v54 = vcvt.f32.s32 %v1838_v49 }
0x1873   : > { %v1840_v52 = vsel %vm1839_vm6, %v1835_v50, inf  ;;  %vm1824_vm7 = vcmp.eq.f32.partialorder %v1821_v45, %v1823_v51  ;;  %v1829_v55 = vcvt.f32.s32 %v1823_v51 }
0x1874   : > { %1841 = vmin.xlane.f32.xlu1 %v1840_v52  ;;  %v1825_v53 = vsel %vm1824_vm7, %v1820_v39, inf  ;;  %v1845_v58 = vshll.u32 %v1844_v54, 16 }
0x1875   : > { %1826 = vmin.xlane.f32.xlu0 %v1825_v53  ;;  %v1830_v60 = vshll.u32 %v1829_v55, 16 }
0x1901   : > { %v1842_v57 = vpop.xlane.xlu1 %1841 }
0x1902   : > { %v1843_v59 = vcvt.f32.s32 %v1842_v57  ;;  %v1827_v48 = vpop.xlane.xlu0 %1826 }
0x1903   : > { %v1828_v61 = vcvt.f32.s32 %v1827_v48 }
0x1904   : > { %v1846_v62 = vadd.s32 %v1845_v58, %v1843_v59 }
0x1905   : > { %v1831_v63 = vadd.s32 %v1830_v60, %v1828_v61 }
0x1906   : > { %vm1848_vm8 = vcmp.eq.s32.totalorder %v5153_v41, %v1846_v62 }
0x1907   : > { %v4263_v1 = vsel %vm1848_vm8, 1.0, %v5058_v4  ;;  %vm1847_vm9 = vcmp.eq.s32.totalorder %v5153_v41, %v1831_v63 }
0x1908   : > { %v1854_v2 = vsel %vm459_vm5, %v4263_v1, 0.0  ;;  %v4262_v5 = vsel %vm1847_vm9, 1.0, %v5058_v4  ;;  %vm4862_vm10 = vmpackc.low %vm1848_vm8, %vm1847_vm9 }
0x1909   : > { %v1853_v56 = vsel %vm459_vm5, %v4262_v5, 0.0  ;;  %4863 = vmatpush3.bf16.msk.msra.mxu0 %vm4862_vm10, %v5059_v14 }
0x190a   : > { %v1855_v6 = vadd.f32 %v1854_v2, %v1853_v56  ;;  %4864 = vmatprep.subr.bf16.mxu0 %v5056_v3 }
0x190c   : > { %4604 = vmatmul.mubr.msk.f32.vlgmr.msra.gmra.mrb[16].mxu0 %vm515_vm13, %v5131_v18  ;;  %v1856_v7 = vrot.slane %v1855_v6, 4 }
0x190d   : > { %4615 = vmatprep.mubr.msk.f32.mxu0 %vm5057_vm2, %v5058_v4 }
0x190e   : > { %v1857_v8 = vadd.f32 %v1856_v7, %v1855_v6 }
0x1910   : > { %v1858_v9 = vrot.slane %v1857_v8, 2 }
0x1912   : > { %v1859_v13 = vadd.f32 %v1858_v9, %v1857_v8 }
0x1914   : > { %v1860_v15 = vrot.slane %v1859_v13, 1 }
0x1916   : > { %v1861_v16 = vadd.f32 %v1860_v15, %v1859_v13 }
0x1918   : > { %v1933_v0 = vmax.f32 %v1861_v16, 1.0  ;;  %vm1932_vm11 = vcmp.gt.f32.partialorder %v1861_v16, 0.5 }
0x191a   : > { %5024 = vrcp.f32 %v1933_v0 }
0x1924   : > { %v5025_v17 = vpop.eup %5024 }
0x19df   : > { %v1928_v19 = vpop.f32.mrb[16].mxu0 }
0x19e0   : > { %v1935_v20 = vmul.f32 %v5025_v17, %v1928_v19  ;;  %v4605_v21 = vpop.f32.mrb[17].mxu0 }
0x19e2   : > { %v5376_v22 = vsel %vm1932_vm11, %v1935_v20, %v5342_v12 }
0x19e3   : > { %4606 = vmatprep.subr.msk.mxu1 %vm195_vm0, %v5376_v22  ;;  %v1939_v23 = vmul.f32 %v5376_v22, %v5376_v22 }
0x19e4   : > { %4607 = vmatpush3.msk.msra.mxu1 %vm195_vm0, %v5376_v22 }
0x19e5   : > { %4609 = vmatmul.mubr.msk.f32.vlgmr.msra.gmra.mrb[14].mxu1 %vm188_vm1, %v5109_v10  ;;  %v1940_v24 = vsel %vm367_vm4, %v1939_v23, 0.0 }
0x19e6   : > { %4620 = vmatprep.mubr.msk.f32.mxu1 %vm188_vm1, %v5111_v11  ;;  %v1941_v25 = vrot.slane %v1940_v24, 4 }
0x19e8   : > { %v1942_v12 = vadd.f32 %v1941_v25, %v1940_v24 }
0x19ea   : > { %v1943_v27 = vrot.slane %v1942_v12, 2 }
0x19ec   : > { %v1944_v28 = vadd.f32 %v1943_v27, %v1942_v12 }
0x19ee   : > { %v1945_v30 = vrot.slane %v1944_v28, 1 }
0x19f0   : > { %v1946_v37 = vadd.f32 %v1945_v30, %v1944_v28 }
0x1ab8   : > { %v4610_v32 = vpop.f32.mrb[14].mxu1 }
0x1ab9   : > { %v2026_v33 = vmul.f32 2.0, %v4610_v32  ;;  %v2016_v34 = vpop.f32.mrb[15].mxu1 }
0x1aba   : > { %v2025_v35 = vmul.f32 2.0, %v2016_v34  ;;  %v2466_v34 = vld [vmem:[%s5809_s1 + $0x20] sm:$0xf] }
0x1abb   : > { %v2028_v36 = vsub.f32 %v5147_v31, %v2026_v33 }
0x1abc   : > { %v2027_v38 = vsub.f32 %v5145_v26, %v2025_v35 }
0x1abd   : > { %v2030_v40 = vadd.f32 %v2028_v36, %v1946_v37 }
0x1abe   : > { %v2029_v42 = vadd.f32 %v2027_v38, %v1946_v37 }
0x1abf   : > { %v2034_v43 = vsel %vm459_vm5, %v2030_v40, inf }
0x1ac0   : > { %2035 = vmin.xlane.f32.xlu1 %v2034_v43  ;;  %v2031_v29 = vsel %vm459_vm5, %v2029_v42, inf }
0x1ac1   : > { %2032 = vmin.xlane.f32.xlu0 %v2031_v29 }
0x1b4d   : > { %v2036_v44 = vpop.xlane.xlu1 %2035 }
0x1b4e   : > { %vm2038_vm12 = vcmp.le.f32.partialorder %v2030_v40, %v2036_v44  ;;  %v2033_v45 = vpop.xlane.xlu0 %2032 }
0x1b4f   : > { %v2040_v46 = vsel %vm2038_vm12, %v5153_v41, 2  ;;  %vm2037_vm14 = vcmp.le.f32.partialorder %v2029_v42, %v2033_v45 }
0x1b50   : > { %v2056_v47 = vsel %vm459_vm5, %v2040_v46, 2147483647  ;;  %v2039_v49 = vsel %vm2037_vm14, %v5153_v41, 2  ;;  %v5433_v46 = vld [vmem:[%s5809_s1 + $0x18] ss:$0 sm:$0xff] }
0x1b51   : > { %v2041_v50 = vsel %vm459_vm5, %v2039_v49, 2147483647  ;;  %v2058_v51 = vshra.s32 %v2056_v47, 16  ;;  %v2057_v54 = vand.u32 65535, %v2056_v47 }
0x1b52   : > { %v2043_v39 = vshra.s32 %v2041_v50, 16  ;;  %v2042_v55 = vand.u32 65535, %v2041_v50 }
0x1b53   : > { %v2060_v52 = vcvt.s32.f32 %v2058_v51  ;;  %v2059_v58 = vcvt.s32.f32 %v2057_v54 }
0x1b54   : > { %v2045_v53 = vcvt.s32.f32 %v2043_v39  ;;  %v2044_v48 = vcvt.s32.f32 %v2042_v55 }
0x1b55   : > { %2061 = vmin.xlane.f32.xlu1 %v2060_v52 }
0x1b56   : > { %2046 = vmin.xlane.f32.xlu0 %v2045_v53 }
0x1be2   : > { %v2062_v57 = vpop.xlane.xlu1 %2061 }
0x1be3   : > { %v2047_v59 = vpop.xlane.xlu0 %2046  ;;  %vm2063_vm15 = vcmp.eq.f32.partialorder %v2060_v52, %v2062_v57  ;;  %v2068_v62 = vcvt.f32.s32 %v2062_v57 }
0x1be4   : > { %v2064_v60 = vsel %vm2063_vm15, %v2059_v58, inf  ;;  %vm2048_vm3 = vcmp.eq.f32.partialorder %v2045_v53, %v2047_v59  ;;  %v2053_v63 = vcvt.f32.s32 %v2047_v59 }
0x1be5   : > { %2065 = vmin.xlane.f32.xlu1 %v2064_v60  ;;  %v2049_v61 = vsel %vm2048_vm3, %v2044_v48, inf  ;;  %v2069_v2 = vshll.u32 %v2068_v62, 16  ;;  %vm4868_vm3 = vmpackc.low %vm459_vm5, %vm459_vm5 }
0x1be6   : > { %2050 = vmin.xlane.f32.xlu0 %v2049_v61  ;;  %v2054_v6 = vshll.u32 %v2053_v63, 16 }
0x1c72   : > { %v2066_v1 = vpop.xlane.xlu1 %2065 }
0x1c73   : > { %v2067_v5 = vcvt.f32.s32 %v2066_v1  ;;  %v2051_v56 = vpop.xlane.xlu0 %2050 }
0x1c74   : > { %v2052_v7 = vcvt.f32.s32 %v2051_v56 }
0x1c75   : > { %v2070_v8 = vadd.s32 %v2069_v2, %v2067_v5 }
0x1c76   : > { %v2055_v9 = vadd.s32 %v2054_v6, %v2052_v7 }
0x1c77   : > { %vm2072_vm6 = vcmp.eq.s32.totalorder %v5153_v41, %v2070_v8 }
0x1c78   : > { %v4271_v13 = vsel %vm2072_vm6, 1.0, %v5058_v4  ;;  %vm2071_vm7 = vcmp.eq.s32.totalorder %v5153_v41, %v2055_v9 }
0x1c79   : > { %v2078_v15 = vsel %vm459_vm5, %v4271_v13, 0.0  ;;  %v4270_v16 = vsel %vm2071_vm7, 1.0, %v5058_v4  ;;  %vm4865_vm8 = vmpackc.low %vm2072_vm6, %vm2071_vm7  ;;  %vm2635_vm6 = vcmask 261120   ;;  %vm2718_vm7 = vcmask 64512  }
0x1c7a   : > { %v2077_v0 = vsel %vm459_vm5, %v4270_v16, 0.0  ;;  %4866 = vmatpush3.bf16.msk.msra.mxu0 %vm4865_vm8, %v5059_v14  ;;  %v2382_v14 = vld [vmem:[%s5809_s1 + $0x10] sm:$0xf] }
0x1c7b   : > { %v2079_v17 = vadd.f32 %v2078_v15, %v2077_v0 }
0x1c7d   : > { %4616 = vmatmul.mubr.msk.f32.vlgmr.msra.gmra.mrb[18].mxu0 %vm515_vm13, %v5131_v18  ;;  %v2080_v19 = vrot.slane %v2079_v17, 4 }
0x1c7f   : > { %v2081_v20 = vadd.f32 %v2080_v19, %v2079_v17 }
0x1c81   : > { %v2082_v21 = vrot.slane %v2081_v20, 2 }
0x1c83   : > { %v2083_v23 = vadd.f32 %v2082_v21, %v2081_v20 }
0x1c85   : > { %v2084_v24 = vrot.slane %v2083_v23, 1 }
0x1c87   : > { %v2085_v25 = vadd.f32 %v2084_v24, %v2083_v23 }
0x1c89   : > { %v2157_v12 = vmax.f32 %v2085_v25, 1.0  ;;  %vm2156_vm9 = vcmp.gt.f32.partialorder %v2085_v25, 0.5 }
0x1c8b   : > { %5026 = vrcp.f32 %v2157_v12 }
0x1c95   : > { %v5027_v27 = vpop.eup %5026 }
0x1d50   : > { %v2152_v28 = vpop.f32.mrb[18].mxu0 }
0x1d51   : > { %v2159_v30 = vmul.f32 %v5027_v27, %v2152_v28  ;;  %v4617_v32 = vpop.f32.mrb[19].mxu0 }
0x1d53   : > { %v2162_v33 = vsel %vm2156_vm9, %v2159_v30, %v5376_v22 }
0x1d54   : > { %4618 = vmatprep.subr.msk.mxu1 %vm195_vm0, %v2162_v33  ;;  %v2163_v22 = vmul.f32 %v2162_v33, %v2162_v33 }
0x1d55   : > { %4619 = vmatpush3.msk.msra.mxu1 %vm195_vm0, %v2162_v33  ;;  %v2550_v33 = vld [vmem:[%s5809_s1 + $0x190] sm:$0xf] }
0x1d56   : > { %4621 = vmatmul.mubr.msk.f32.vlgmr.msra.gmra.mrb[16].mxu1 %vm188_vm1, %v5109_v10  ;;  %4630 = vmatprep.subr.msk.mxu1 %vm195_vm0, %v2382_v14  ;;  %v2164_v35 = vsel %vm367_vm4, %v2163_v22, 0.0 }
0x1d57   : > { %4632 = vmatprep.mubr.msk.f32.mxu1 %vm188_vm1, %v5111_v11  ;;  %4631 = vmatpush3.msk.msra.mxu1 %vm195_vm0, %v2382_v14  ;;  %v2165_v36 = vrot.slane %v2164_v35, 4  ;;  %v2631_v14 = vld [vmem:[%s5809_s1 + $0x1c8] sm:$0xff] }
0x1d58   : > { %4635 = vmatprep.subr.msk.mxu1 %vm195_vm0, %v2466_v34 }
0x1d59   : > { %v2166_v37 = vadd.f32 %v2165_v36, %v2164_v35  ;;  %v2633_v35 = vld [vmem:[%s5809_s1 + $0x1d8] sm:$0xff]  ;;  %v2634_v36 = vld [vmem:[%s5809_s1 + $0x1e0] sm:$0xff] }
0x1d5a   : > { %4633 = vmatmul.mubr.msk.f32.vlgmr.msra.gmra.mrb[18].mxu1 %vm188_vm1, %v5109_v10 }
0x1d5b   : > { %4637 = vmatprep.mubr.msk.f32.mxu1 %vm188_vm1, %v5111_v11  ;;  %4636 = vmatpush3.msk.msra.mxu1 %vm195_vm0, %v2466_v34  ;;  %v2167_v38 = vrot.slane %v2166_v37, 2  ;;  %v2632_v34 = vld [vmem:[%s5809_s1 + $0x1d0] sm:$0xff] }
0x1d5c   : > { %v4873_v22 = vpack.c.bf16 %v2632_v34, %v2631_v14 }
0x1d5d   : > { %v2168_v40 = vadd.f32 %v2167_v38, %v2166_v37  ;;  %v4877_v37 = vpack.c.bf16 %v2634_v36, %v2633_v35  ;;  %v4288_v38 = vld [vmem:[%s5809_s1 + $0x28] ss:$0 sm:$0xff]  ;;  %v3002_v35 = vld [vmem:[%s5809_s1 + $0x280] sm:$0xff] }
0x1d5e   : > { %4638 = vmatmul.mubr.msk.f32.vlgmr.msra.gmra.mrb[20].mxu1 %vm188_vm1, %v5109_v10  ;;  %4874 = vmatprep.subr.bf16.mxu1 %v4873_v22 }
0x1d5f   : > { %v2169_v42 = vrot.slane %v2168_v40, 1  ;;  %4876 = vmatpush3.bf16.msra.mxu1 %v4873_v22  ;;  %v3003_v22 = vld [vmem:[%s5809_s1 + $0x288] sm:$0xff] }
0x1d60   : > { %4878 = vmatprep.subr.bf16.mxu1 %v4877_v37 }
0x1d61   : > { %v2170_v49 = vadd.f32 %v2169_v42, %v2168_v40 }
0x1d63   : > { %4880 = vmatpush3.bf16.msra.mxu1 %v4877_v37 }
0x1e29   : > { %v4622_v43 = vpop.f32.mrb[16].mxu1 }
0x1e2a   : > { %v2250_v29 = vmul.f32 2.0, %v4622_v43  ;;  %v2240_v44 = vpop.f32.mrb[17].mxu1 }
0x1e2b   : > { %v2249_v45 = vmul.f32 2.0, %v2240_v44 }
0x1e2c   : > { %v2252_v47 = vsub.f32 %v5147_v31, %v2250_v29 }
0x1e2d   : > { %v2251_v50 = vsub.f32 %v5145_v26, %v2249_v45  ;;  %v4634_v51 = vpop.f32.mrb[18].mxu1 }
0x1e2e   : > { %v5438_v39 = vadd.f32 %v4634_v51, %v5433_v46  ;;  %v5440_v52 = vpop.f32.mrb[19].mxu1  ;;  %v2254_v53 = vadd.f32 %v2252_v47, %v2170_v49  ;;  %v2902_v51 = vld [vmem:[%s5809_s1 + $0x1a0] sm:$0xff] }
0x1e2f   : > { %v2253_v54 = vadd.f32 %v2251_v50, %v2170_v49  ;;  %v2901_v50 = vld [vmem:[%s5809_s1 + $0x198] sm:$0xff] }
0x1e30   : > { %v2258_v55 = vsel %vm459_vm5, %v2254_v53, inf }
0x1e31   : > { %v5443_v57 = vpop.f32.mrb[20].mxu1  ;;  %2259 = vmin.xlane.f32.xlu1 %v2258_v55  ;;  %v2255_v58 = vsel %vm459_vm5, %v2253_v54, inf }
0x1e32   : > { %v5446_v59 = vpop.f32.mrb[21].mxu1  ;;  %2256 = vmin.xlane.f32.xlu0 %v2255_v58  ;;  %v2547_v43 = vadd.f32 %v5443_v57, %v4288_v38  ;;  %v2800_v57 = vld [vmem:[%s5809_s1 + $0x1a8] sm:$0xff]  ;;  %v2801_v58 = vld [vmem:[%s5809_s1 + $0x1b0] sm:$0xff] }
0x1e33   : > { %v2542_v29 = vadd.f32 %v4288_v38, %v5446_v59  ;;  %v2802_v59 = vld [vmem:[%s5809_s1 + $0x1b8] sm:$0xff] }
0x1ebe   : > { %v2260_v31 = vpop.xlane.xlu1 %2259 }
0x1ebf   : > { %vm2262_vm4 = vcmp.le.f32.partialorder %v2254_v53, %v2260_v31  ;;  %v2257_v26 = vpop.xlane.xlu0 %2256  ;;  %v5511_v53 = vpack.c.bf16 %v2902_v51, %v2901_v50  ;;  %v2803_v31 = vld [vmem:[%s5809_s1 + $0x1c0] sm:$0xff]  ;;  %v3188_v51 = vld [vmem:[%s5809_s1 + $0xd0] sm:$0xff] }
0x1ec0   : > { %v2264_v48 = vsel %vm2262_vm4, %v5153_v41, 2  ;;  %vm2261_vm10 = vcmp.le.f32.partialorder %v2253_v54, %v2257_v26  ;;  %vm4113_vm4 = vcmask 253952  }
0x1ec1   : > { %v2280_v60 = vsel %vm459_vm5, %v2264_v48, 2147483647  ;;  %v2263_v61 = vsel %vm2261_vm10, %v5153_v41, 2  ;;  %4882 = vmatprep.subr.bf16.mxu1 %v5511_v53 }
0x1ec2   : > { %v2265_v62 = vsel %vm459_vm5, %v2263_v61, 2147483647  ;;  %v2282_v63 = vshra.s32 %v2280_v60, 16  ;;  %v2281_v56 = vand.u32 65535, %v2280_v60 }
0x1ec3   : > { %v2267_v1 = vshra.s32 %v2265_v62, 16  ;;  %v2266_v6 = vand.u32 65535, %v2265_v62  ;;  %v3091_v62 = vld [vmem:[%s5809_s1 + $0x40] sm:$0xff] }
0x1ec4   : > { %v2284_v2 = vcvt.s32.f32 %v2282_v63  ;;  %v2283_v8 = vcvt.s32.f32 %v2281_v56  ;;  %v3094_v56 = vld [vmem:[%s5809_s1 + $0x58] sm:$0xff] }
0x1ec5   : > { %v2269_v5 = vcvt.s32.f32 %v2267_v1  ;;  %v2268_v13 = vcvt.s32.f32 %v2266_v6  ;;  %v3092_v1 = vld [vmem:[%s5809_s1 + $0x48] sm:$0xff] }
0x1ec6   : > { %2285 = vmin.xlane.f32.xlu1 %v2284_v2 }
0x1ec7   : > { %2270 = vmin.xlane.f32.xlu0 %v2269_v5 }
0x1f53   : > { %v2286_v7 = vpop.xlane.xlu1 %2285 }
0x1f54   : > { %v2271_v9 = vpop.xlane.xlu0 %2270  ;;  %vm2287_vm11 = vcmp.eq.f32.partialorder %v2284_v2, %v2286_v7  ;;  %v2292_v0 = vcvt.f32.s32 %v2286_v7  ;;  %v4897_v2 = vpack.c.bf16 %v3092_v1, %v3091_v62  ;;  %v3095_v7 = vld [vmem:[%s5809_s1 + $0x60] sm:$0xff] }
0x1f55   : > { %v2288_v15 = vsel %vm2287_vm11, %v2283_v8, inf  ;;  %vm2272_vm12 = vcmp.eq.f32.partialorder %v2269_v5, %v2271_v9  ;;  %v2277_v17 = vcvt.f32.s32 %v2271_v9  ;;  %v3093_v5 = vld [vmem:[%s5809_s1 + $0x50] sm:$0xff]  ;;  %v3096_v8 = vld [vmem:[%s5809_s1 + $0x68] sm:$0xff]  ;;  %v3198_v62 = vld [vmem:[%s5809_s1 + $0x120] sm:$0xff] }
0x1f56   : > { %2289 = vmin.xlane.f32.xlu1 %v2288_v15  ;;  %v2273_v16 = vsel %vm2272_vm12, %v2268_v13, inf  ;;  %v2293_v20 = vshll.u32 %v2292_v0, 16  ;;  %v4901_v6 = vpack.c.bf16 %v3094_v56, %v3093_v5  ;;  %v4905_v9 = vpack.c.bf16 %v3096_v8, %v3095_v7  ;;  %v3097_v13 = vld [vmem:[%s5809_s1 + $0x70] sm:$0xff]  ;;  %v3098_v15 = vld [vmem:[%s5809_s1 + $0x78] sm:$0xff]  ;;  %v3099_v0 = vld [vmem:[%s5809_s1 + $0x80] sm:$0xff] }
0x1f57   : > { %2274 = vmin.xlane.f32.xlu0 %v2273_v16  ;;  %v2278_v24 = vshll.u32 %v2277_v17, 16  ;;  %v4909_v16 = vpack.c.bf16 %v3098_v15, %v3097_v13  ;;  %v3100_v17 = vld [vmem:[%s5809_s1 + $0x88] sm:$0xff]  ;;  %v3200_v56 = vld [vmem:[%s5809_s1 + $0x130] sm:$0xff]  ;;  %v3201_v7 = vld [vmem:[%s5809_s1 + $0x138] sm:$0x1] }
0x1f58   : > { %v3199_v5 = vld [vmem:[%s5809_s1 + $0x128] sm:$0xff]  ;;  %4998 = vpush %v3201_v7 }
0x1f89   : > { %s4999_s9 = spop %4998 }
0x1fe3   : > { %v2290_v19 = vpop.xlane.xlu1 %2289 }
0x1fe4   : > { %v2291_v21 = vcvt.f32.s32 %v2290_v19  ;;  %v2275_v23 = vpop.xlane.xlu0 %2274  ;;  %v4913_v19 = vpack.c.bf16 %v3100_v17, %v3099_v0 }
0x1fe5   : > { %v2276_v25 = vcvt.f32.s32 %v2275_v23 }
0x1fe6   : > { %v2294_v12 = vadd.s32 %v2293_v20, %v2291_v21  ;;  %v3101_v20 = vld [vmem:[%s5809_s1 + $0x90] sm:$0xff]  ;;  %v3102_v21 = vld [vmem:[%s5809_s1 + $0x98] sm:$0xff] }
0x1fe7   : > { %v2279_v27 = vadd.s32 %v2278_v24, %v2276_v25  ;;  %v4917_v23 = vpack.c.bf16 %v3102_v21, %v3101_v20  ;;  %v3103_v24 = vld [vmem:[%s5809_s1 + $0xa0] sm:$0xff]  ;;  %v3104_v25 = vld [vmem:[%s5809_s1 + $0xa8] sm:$0xff] }
0x1fe8   : > { %vm2296_vm14 = vcmp.eq.s32.totalorder %v5153_v41, %v2294_v12  ;;  %v4921_v12 = vpack.c.bf16 %v3104_v25, %v3103_v24 }
0x1fe9   : > { %v5454_v28 = vsel %vm2296_vm14, 1.0, %v5058_v4  ;;  %vm2295_vm15 = vcmp.eq.s32.totalorder %v5153_v41, %v2279_v27  ;;  %v2717_v41 = vld [vmem:[%s5809_s1 + $0x268] sm:$0xff]  ;;  %v3001_v27 = vld [vmem:[%s5809_s1 + $0x278] sm:$0xff] }
0x1fea   : > { %v5458_v30 = vsel %vm2295_vm15, 1.0, %v5058_v4 }
0x1feb   : > { %v4867_v32 = vpack.c.bf16 %v5454_v28, %v5458_v30  ;;  %4627 = vmatprep.mubr.msk.f32.mxu0 %vm459_vm5, %v5458_v30 }
0x1fed   : > { %4869 = vmatprep.subr.msk.bf16.mxu0 %vm4868_vm3, %v4867_v32 }
0x1fee   : > { %4872 = vmatpush3.bf16.xpose.msk.msra.mxu0 %vm4868_vm3, %v4867_v32  ;;  %v3000_v32 = vld [vmem:[%s5809_s1 + $0x270] sm:$0xff] }
0x1fef   : > { %4640 = vmatprep.subr.msk.mxu0 %vm195_vm0, %v2550_v33 }
0x1ff5   : > { %4628 = vmatmul.mubr.msk.f32.vlgmr.msra.gmra.mrb[20].mxu0 %vm459_vm5, %v5454_v28 }
0x1ff6   : > { %4642 = vmatprep.mubr.msk.f32.mxu0 %vm188_vm1, %v5111_v11  ;;  %4641 = vmatpush3.msk.msra.mxu0 %vm195_vm0, %v2550_v33 }
0x1ff7   : > { %4656 = vmatprep.subr.mxu0 %v2717_v41 }
0x1ff9   : > { %4643 = vmatmul.mubr.msk.f32.vlgmr.msra.gmra.mrb[22].mxu0 %vm188_vm1, %v5109_v10 }
0x1ffa   : > { %4657 = vmatpush3.msra.mxu0 %v2717_v41 }
0x1ffb   : > { %4661 = vmatprep.subr.msk.mxu0 %vm195_vm0, %v5131_v18 }
0x20c8   : > { %v5497_v40 = vpop.f32.mrb[20].mxu0 }
0x20c9   : > { %v5499_v42 = vpop.f32.mrb[21].mxu0  ;;  %vm3282_vm8 = vcmp.gt.f32.partialorder %v5497_v40, 0.5 }
0x20ca   : > { %vm3281_vm9 = vcmp.gt.f32.partialorder %v5499_v42, 0.5 }
0x20cc   : > { %v4644_v44 = vpop.f32.mrb[22].mxu0 }
0x20cd   : > { %v2630_v45 = vmul.f32 %v4644_v44, %v2547_v43  ;;  %v2620_v47 = vpop.f32.mrb[23].mxu0 }
0x20ce   : > { %v2629_v49 = vmul.f32 %v2620_v47, %v2542_v29  ;;  %v3186_v47 = vld [vmem:[%s5809_s1 + $0xc0] sm:$0xff] }
0x20d0   : > { %4653 = vmatprep.mubr.msk.f32.mxu1 %vm2635_vm6, %v2629_v49  ;;  %v3187_v49 = vld [vmem:[%s5809_s1 + $0xc8] sm:$0xff] }
0x20d1   : > { %4654 = vmatmul.mubr.msk.f32.vlgmr.msra.gmra.mrb[22].mxu1 %vm2635_vm6, %v2630_v45  ;;  %v3185_v45 = vld [vmem:[%s5809_s1 + $0xb8] sm:$0xff] }
0x20d2   : > { %4884 = vmatpush3.bf16.msra.mxu1 %v5511_v53  ;;  %v4925_v50 = vpack.c.bf16 %v3186_v47, %v3185_v45  ;;  %v3394_v47 = vld [vmem:[%s5809_s1 + $0x1f8] sm:$0xff] }
0x21a4   : > { %v4655_v54 = vpop.f32.mrb[22].mxu1 }
0x21a5   : > { %v2708_v55 = vpop.f32.mrb[23].mxu1 }
0x21a6   : > { %4658 = vmatprep.mubr.msk.f32.mxu0 %vm2718_vm7, %v2708_v55  ;;  %v3190_v55 = vld [vmem:[%s5809_s1 + $0xe0] sm:$0xff] }
0x21a7   : > { %4659 = vmatmul.mubr.msk.f32.vlgmr.msra.gmra.mrb[24].mxu0 %vm2718_vm7, %v4655_v54  ;;  %v4929_v54 = vpack.c.bf16 %v3188_v51, %v3187_v49  ;;  %v3395_v49 = vld [vmem:[%s5809_s1 + $0x200] sm:$0xff] }
0x21a8   : > { %4662 = vmatpush3.msk.msra.mxu0 %vm195_vm0, %v5131_v18  ;;  %4663 = vmatprep.mubr.msk.f32.mxu0 %vm188_vm1, %v2800_v57  ;;  %v2458_v18 = vadd.f32 %v5433_v46, %v5440_v52  ;;  %v3089_v46 = vld [vmem:[%s5809_s1 + $0x30] sm:$0xff]  ;;  %v3090_v52 = vld [vmem:[%s5809_s1 + $0x38] sm:$0xff] }
0x21a9   : > { %v4893_v63 = vpack.c.bf16 %v3090_v52, %v3089_v46  ;;  %v3197_v52 = vld [vmem:[%s5809_s1 + $0x118] sm:$0xff] }
0x21ab   : > { %4664 = vmatmul.mubr.msk.f32.vlgmr.msra.gmra.mrb[26].mxu0 %vm188_vm1, %v2801_v58  ;;  %4894 = vmatprep.subr.bf16.mxu1 %v4893_v63  ;;  %v3191_v58 = vld [vmem:[%s5809_s1 + $0xe8] sm:$0xff] }
0x21ac   : > { %4666 = vmatprep.mubr.msk.f32.mxu0 %vm188_vm1, %v2802_v59  ;;  %v3192_v59 = vld [vmem:[%s5809_s1 + $0xf0] sm:$0xff] }
0x21af   : > { %4667 = vmatmul.mubr.msk.f32.gmra.mrb[28].mxu0 %vm188_vm1, %v2803_v31  ;;  %v4937_v31 = vpack.c.bf16 %v3192_v59, %v3191_v58  ;;  %v3398_v59 = vld [vmem:[%s5809_s1 + $0x218] sm:$0xff] }
0x21b0   : > { %4687 = vmatprep.mubr.msk.f32.mxu0 %vm2635_vm6, %v2458_v18  ;;  %v3193_v18 = vld [vmem:[%s5809_s1 + $0xf8] sm:$0xff] }
0x227e   : > { %v4665_v26 = vpop.f32.mrb[26].mxu0 }
0x227f   : > { %v2882_v48 = vpop.f32.mrb[27].mxu0 }
0x2280   : > { %4673 = vmatprep.mubr.msk.f32.mxu1 %vm515_vm13, %v2882_v48 }
0x2281   : > { %4674 = vmatmul.mubr.msk.f32.vlgmr.msra.gmra.mrb[24].mxu1 %vm515_vm13, %v4665_v26  ;;  %v3194_v26 = vld [vmem:[%s5809_s1 + $0x100] sm:$0xff] }
0x2282   : > { %v4668_v60 = vpop.f32.mrb[28].mxu0  ;;  %4896 = vmatpush3.bf16.msra.mxu1 %v4893_v63  ;;  %v4941_v48 = vpack.c.bf16 %v3194_v26, %v3193_v18  ;;  %v4949_v63 = vpack.c.bf16 %v3198_v62, %v3197_v52  ;;  %v3400_v26 = vld [vmem:[%s5809_s1 + $0x228] sm:$0xff] }
0x2283   : > { %v2892_v61 = vpop.f32.mrb[29].mxu0  ;;  %4898 = vmatprep.subr.bf16.mxu1 %v4897_v2  ;;  %v3404_v62 = vld [vmem:[%s5809_s1 + $0x248] sm:$0xff] }
0x2284   : > { %4676 = vmatprep.mubr.msk.f32.mxu1 %vm515_vm13, %v2892_v61  ;;  %v3196_v61 = vld [vmem:[%s5809_s1 + $0x110] sm:$0xff] }
0x2285   : > { %4677 = vmatmul.mubr.msk.f32.gmra.mrb[26].mxu1 %vm515_vm13, %v4668_v60  ;;  %v3195_v60 = vld [vmem:[%s5809_s1 + $0x108] sm:$0xff] }
0x2286   : > { %4900 = vmatpush3.bf16.msra.mxu1 %v4897_v2  ;;  %v4945_v46 = vpack.c.bf16 %v3196_v61, %v3195_v60  ;;  %v3402_v61 = vld [vmem:[%s5809_s1 + $0x238] sm:$0xff] }
0x2287   : > { %4902 = vmatprep.subr.bf16.mxu1 %v4901_v6 }
0x228a   : > { %4904 = vmatpush3.bf16.msra.mxu1 %v4901_v6  ;;  %v4953_v6 = vpack.c.bf16 %v3200_v56, %v3199_v5  ;;  %v3407_v5 = vld [vmem:[%s5809_s1 + $0x260] sm:$0xff] }
0x228b   : > { %4906 = vmatprep.subr.bf16.mxu1 %v4905_v9 }
0x228e   : > { %4908 = vmatpush3.bf16.msra.mxu1 %v4905_v9 }
0x228f   : > { %4910 = vmatprep.subr.bf16.mxu1 %v4909_v16 }
0x2292   : > { %4912 = vmatpush3.bf16.msra.mxu1 %v4909_v16  ;;  %v3204_v16 = vstv %s4999_s9 }
0x2293   : > { %4914 = vmatprep.subr.bf16.mxu1 %v4913_v19 }
0x2296   : > { %4916 = vmatpush3.bf16.msra.mxu1 %v4913_v19 }
0x2297   : > { %4918 = vmatprep.subr.bf16.mxu1 %v4917_v23 }
0x229a   : > { %4920 = vmatpush3.bf16.msra.mxu1 %v4917_v23 }
0x229b   : > { %4922 = vmatprep.subr.bf16.mxu1 %v4921_v12 }
0x229e   : > { %4924 = vmatpush3.bf16.msra.mxu1 %v4921_v12 }
0x229f   : > { %4958 = vmatprep.subr.bf16.mxu1 %v5511_v53 }
0x2354   : > { %v4675_v33 = vpop.f32.mrb[24].mxu1 }
0x2355   : > { %v3005_v41 = vmul.f32 %v4675_v33, %v3001_v27  ;;  %v2981_v14 = vpop.f32.mrb[25].mxu1 }
0x2356   : > { %v3004_v34 = vmul.f32 %v3000_v32, %v2981_v14 }
0x2358   : > { %v4885_v36 = vpack.c.bf16 %v3005_v41, %v3004_v34  ;;  %v4678_v37 = vpop.f32.mrb[26].mxu1 }
0x2359   : > { %v3007_v38 = vmul.f32 %v4678_v37, %v3003_v22  ;;  %v2991_v43 = vpop.f32.mrb[27].mxu1 }
0x235a   : > { %v3006_v29 = vmul.f32 %v3002_v35, %v2991_v43  ;;  %4886 = vmatprep.subr.bf16.mxu0 %v4885_v36  ;;  %v3392_v43 = vld [vmem:[%s5809_s1 + $0x1e8] sm:$0xff] }
0x235b   : > { %4888 = vmatpush3.bf16.msra.mxu0 %v4885_v36 }
0x235c   : > { %v4889_v44 = vpack.c.bf16 %v3007_v38, %v3006_v29  ;;  %v3393_v29 = vld [vmem:[%s5809_s1 + $0x1f0] sm:$0xff] }
0x235e   : > { %4890 = vmatprep.subr.bf16.mxu0 %v4889_v44 }
0x235f   : > { %4892 = vmatpush3.bf16.msra.mxu0 %v4889_v44  ;;  %v4961_v44 = vpack.c.bf16 %v3393_v29, %v3392_v43 }
0x2360   : > { %4926 = vmatprep.subr.bf16.mxu0 %v4925_v50 }
0x2362   : > { %4688 = vmatmul.mubr.msk.f32.vlgmr.msra.gmra.mrb[24].mxu0 %vm2635_vm6, %v5438_v39  ;;  %v3189_v39 = vld [vmem:[%s5809_s1 + $0xd8] sm:$0xff] }
0x2363   : > { %4928 = vmatpush3.bf16.msra.mxu0 %v4925_v50  ;;  %v4933_v57 = vpack.c.bf16 %v3190_v55, %v3189_v39  ;;  %v4965_v39 = vpack.c.bf16 %v3395_v49, %v3394_v47  ;;  %v3396_v55 = vld [vmem:[%s5809_s1 + $0x208] sm:$0xff] }
0x2364   : > { %4930 = vmatprep.subr.bf16.mxu0 %v4929_v54 }
0x2367   : > { %4932 = vmatpush3.bf16.msra.mxu0 %v4929_v54 }
0x2368   : > { %4934 = vmatprep.subr.bf16.mxu0 %v4933_v57 }
0x236b   : > { %4936 = vmatpush3.bf16.msra.mxu0 %v4933_v57  ;;  %v3397_v57 = vld [vmem:[%s5809_s1 + $0x210] sm:$0xff] }
0x236c   : > { %4938 = vmatprep.subr.bf16.mxu0 %v4937_v31  ;;  %v4969_v58 = vpack.c.bf16 %v3397_v57, %v3396_v55 }
0x236f   : > { %4940 = vmatpush3.bf16.msra.mxu0 %v4937_v31  ;;  %v3399_v31 = vld [vmem:[%s5809_s1 + $0x220] sm:$0xff] }
0x2370   : > { %4942 = vmatprep.subr.bf16.mxu0 %v4941_v48  ;;  %v4973_v18 = vpack.c.bf16 %v3399_v31, %v3398_v59 }
0x2373   : > { %4944 = vmatpush3.bf16.msra.mxu0 %v4941_v48  ;;  %v3401_v48 = vld [vmem:[%s5809_s1 + $0x230] sm:$0xff] }
0x2374   : > { %4946 = vmatprep.subr.bf16.mxu0 %v4945_v46  ;;  %v4977_v60 = vpack.c.bf16 %v3401_v48, %v3400_v26 }
0x2377   : > { %4948 = vmatpush3.bf16.msra.mxu0 %v4945_v46  ;;  %v3403_v46 = vld [vmem:[%s5809_s1 + $0x240] sm:$0xff] }
0x2378   : > { %4950 = vmatprep.subr.bf16.mxu0 %v4949_v63  ;;  %v4981_v52 = vpack.c.bf16 %v3403_v46, %v3402_v61 }
0x237b   : > { %4952 = vmatpush3.bf16.msra.mxu0 %v4949_v63  ;;  %v3405_v63 = vld [vmem:[%s5809_s1 + $0x250] sm:$0xff] }
0x237c   : > { %4954 = vmatprep.subr.bf16.mxu0 %v4953_v6 }
0x237f   : > { %4956 = vmatpush3.bf16.msra.mxu0 %v4953_v6 }
0x2435   : > { %v4689_v1 = vpop.f32.mrb[24].mxu0 }
0x2436   : > { %v3080_v2 = vpop.f32.mrb[25].mxu0 }
0x2437   : > { %4722 = vmatprep.mubr.f32.mxu1 %v3080_v2  ;;  %v3406_v2 = vld [vmem:[%s5809_s1 + $0x258] sm:$0xff] }
0x2438   : > { %4723 = vmatmul.mubr.f32.vlgmr.msra.gmra.mrb[28].mxu1 %v4689_v1  ;;  %v4985_v1 = vpack.c.bf16 %v3405_v63, %v3404_v62  ;;  %v4989_v56 = vpack.c.bf16 %v3407_v5, %v3406_v2  ;;  %v4035_v2 = vld [vmem:[%s5809_s1 + $0x170] sm:$0xff]  ;;  %v4036_v5 = vld [vmem:[%s5809_s1 + $0x178] sm:$0xff] }
0x2439   : > { %4960 = vmatpush3.bf16.msra.mxu1 %v5511_v53  ;;  %v4310_v53 = vld [vmem:[%s5809_s1 + $0xb0] ss:$0 sm:$0xff] }
0x243a   : > { %4962 = vmatprep.subr.bf16.mxu1 %v4961_v44 }
0x250b   : > { %v4724_v8 = vpop.f32.mrb[28].mxu1 }
0x250c   : > { %v3176_v9 = vpop.f32.mrb[29].mxu1  ;;  %v5662_v15 = vadd.f32 %v4724_v8, %v4310_v53 }
0x250d   : > { %v5660_v13 = vadd.f32 %v4310_v53, %v3176_v9  ;;  %v3483_v9 = vld [vmem:[%s5809_s1 + $0x140] sm:$0xff] }
0x250e   : > { %4802 = vmatprep.subr.mxu0 %v3483_v9 }
0x250f   : > { %4757 = vmatprep.mubr.f32.mxu0 %v5660_v13 }
0x2510   : > { %4758 = vmatmul.mubr.f32.vlgmr.msra.gmra.mrb[30].mxu0 %v5662_v15 }
0x2511   : > { %4803 = vmatpush3.msra.mxu0 %v3483_v9 }
0x25e3   : > { %v4759_v0 = vpop.f32.mrb[30].mxu0 }
0x25e4   : > { %v3278_v17 = vadd.f32 %v4759_v0, %v3204_v16  ;;  %v3272_v19 = vpop.f32.mrb[31].mxu0 }
0x25e5   : > { %v3273_v20 = vadd.f32 %v3272_v19, %v3204_v16  ;;  %v3570_v16 = vld [vmem:[%s5809_s1 + $0x290] sm:$0xf] }
0x25e6   : > { %v3284_v21 = vsel %vm3282_vm8, %v3278_v17, -1e+30  ;;  %4807 = vmatprep.subr.msk.mxu0 %vm195_vm0, %v3570_v16 }
0x25e7   : > { %v3288_v23 = vsel %vm515_vm13, %v3284_v21, -inf  ;;  %v3283_v24 = vsel %vm3281_vm9, %v3273_v20, -1e+30 }
0x25e8   : > { %3289 = vmax.xlane.f32.xlu1 %v3288_v23  ;;  %v3285_v25 = vsel %vm515_vm13, %v3283_v24, -inf }
0x25e9   : > { %3286 = vmax.xlane.f32.xlu0 %v3285_v25 }
0x2675   : > { %v3290_v12 = vpop.xlane.xlu1 %3289 }
0x2676   : > { %v3292_v27 = vsub.f32 %v3284_v21, %v3290_v12  ;;  %v3287_v32 = vpop.xlane.xlu0 %3286  ;;  %v3929_v12 = vld [vmem:[%s5809_s1 + $0x2a0] sm:$0xff] }
0x2677   : > { %v3291_v33 = vsub.f32 %v3283_v24, %v3287_v32  ;;  %v3849_v24 = vld [vmem:[%s5809_s1 + $0x298] sm:$0x3] }
0x2678   : > { %v3295_v41 = vmul.f32 1.442695, %v3292_v27 }
0x2679   : > { %v3293_v14 = vmul.f32 1.442695, %v3291_v33  ;;  %v4319_v33 = vld [vmem:[%s5809_s1 + $0x158] ss:$0 sm:$0xff] }
0x267a   : > { %5028 = vpow2.f32 %v3295_v41 }
0x267b   : > { %5030 = vpow2.f32 %v3293_v14 }
0x2684   : > { %v5029_v34 = vpop.eup %5028 }
0x2685   : > { %v5031_v22 = vpop.eup %5030  ;;  %v3298_v35 = vsel %vm3282_vm8, %v5029_v34, 0.0 }
0x2686   : > { %v3302_v36 = vsel %vm515_vm13, %v3298_v35, 0.0  ;;  %v3297_v37 = vsel %vm3281_vm9, %v5031_v22, 0.0 }
0x2687   : > { %3303 = vadd.xlane.f32.xlu1 %v3302_v36  ;;  %v3299_v38 = vsel %vm515_vm13, %v3297_v37, 0.0 }
0x2688   : > { %3300 = vadd.xlane.f32.xlu0 %v3299_v38 }
0x2714   : > { %v3304_v40 = vpop.xlane.xlu1 %3303 }
0x2715   : > { %5032 = vrcp.f32 %v3304_v40  ;;  %v3301_v45 = vpop.xlane.xlu0 %3300 }
0x2716   : > { %5034 = vrcp.f32 %v3301_v45 }
0x271f   : > { %v5033_v42 = vpop.eup %5032 }
0x2720   : > { %v5035_v50 = vpop.eup %5034  ;;  %v3308_v54 = vmul.f32 %v5033_v42, %v3298_v35 }
0x2721   : > { %v3307_v51 = vmul.f32 %v5035_v50, %v3297_v37 }
0x2723   : > { %4764 = vmatprep.mubr.msk.f32.mxu1 %vm515_vm13, %v3307_v51 }
0x2724   : > { %4765 = vmatmul.mubr.msk.f32.vlgmr.msra.gmra.mrb[30].mxu1 %vm515_vm13, %v3308_v54 }
0x2725   : > { %4964 = vmatpush3.bf16.msra.mxu1 %v4961_v44 }
0x2726   : > { %4966 = vmatprep.subr.bf16.mxu1 %v4965_v39 }
0x2729   : > { %4968 = vmatpush3.bf16.msra.mxu1 %v4965_v39 }
0x272a   : > { %4970 = vmatprep.subr.bf16.mxu1 %v4969_v58 }
0x272d   : > { %4972 = vmatpush3.bf16.msra.mxu1 %v4969_v58 }
0x272e   : > { %4974 = vmatprep.subr.bf16.mxu1 %v4973_v18 }
0x2731   : > { %4976 = vmatpush3.bf16.msra.mxu1 %v4973_v18 }
0x2732   : > { %4978 = vmatprep.subr.bf16.mxu1 %v4977_v60 }
0x2735   : > { %4980 = vmatpush3.bf16.msra.mxu1 %v4977_v60 }
0x2736   : > { %4982 = vmatprep.subr.bf16.mxu1 %v4981_v52 }
0x2739   : > { %4984 = vmatpush3.bf16.msra.mxu1 %v4981_v52 }
0x273a   : > { %4986 = vmatprep.subr.bf16.mxu1 %v4985_v1 }
0x273d   : > { %4988 = vmatpush3.bf16.msra.mxu1 %v4985_v1 }
0x273e   : > { %4990 = vmatprep.subr.bf16.mxu1 %v4989_v56 }
0x2741   : > { %4992 = vmatpush3.bf16.msra.mxu1 %v4989_v56  ;;  %v4994_v56 = vpack.c.bf16 %v4036_v5, %v4035_v2 }
0x27f7   : > { %v4766_v6 = vpop.f32.mrb[30].mxu1 }
0x27f8   : > { %v3381_v7 = vpop.f32.mrb[31].mxu1  ;;  %v3391_v8 = vmul.f32 %v4766_v6, %v5662_v15  ;;  %v3736_v15 = vld [vmem:[%s5809_s1 + $0x160] sm:$0xff] }
0x27f9   : > { %v3390_v53 = vmul.f32 %v3381_v7, %v5660_v13  ;;  %v3649_v13 = vld [vmem:[%s5809_s1 + $0x150] sm:$0xff] }
0x27fb   : > { %4799 = vmatprep.mubr.f32.mxu1 %v3390_v53 }
0x27fc   : > { %4800 = vmatmul.mubr.f32.vlgmr.msra.gmra.mrb[32].mxu1 %v3391_v8 }
0x28cf   : > { %v4801_v0 = vpop.f32.mrb[32].mxu1 }
0x28d0   : > { %v3474_v17 = vpop.f32.mrb[33].mxu1 }
0x28d1   : > { %4804 = vmatprep.mubr.msk.f32.mxu0 %vm2718_vm7, %v3474_v17 }
0x28d2   : > { %4805 = vmatmul.mubr.msk.f32.vlgmr.msra.gmra.mrb[32].mxu0 %vm2718_vm7, %v4801_v0 }
0x28d3   : > { %4809 = vmatprep.mubr.msk.f32.mxu0 %vm188_vm1, %v5111_v11  ;;  %4808 = vmatpush3.msk.msra.mxu0 %vm195_vm0, %v3570_v16  ;;  %v4313_v11 = vld [vmem:[%s5809_s1 + $0x148] ss:$0 sm:$0xff]  ;;  %vm3850_vm0 = vcmask 1041408  }
0x28d4   : > { %4812 = vmatprep.subr.mxu0 %v3649_v13 }
0x28d6   : > { %4810 = vmatmul.mubr.msk.f32.vlgmr.msra.gmra.mrb[34].mxu0 %vm188_vm1, %v5109_v10 }
0x28d7   : > { %4813 = vmatpush3.msra.mxu0 %v3649_v13 }
0x28d8   : > { %4817 = vmatprep.subr.mxu0 %v3736_v15 }
0x29a5   : > { %v4806_v19 = vpop.f32.mrb[32].mxu0 }
0x29a6   : > { %v3561_v20 = vpop.f32.mrb[33].mxu0  ;;  %v3567_v25 = vadd.f32 %v4806_v19, %v4313_v11 }
0x29a7   : > { %v3562_v10 = vadd.f32 %v4313_v11, %v3561_v20 }
0x29a9   : > { %v4811_v21 = vpop.f32.mrb[34].mxu0 }
0x29aa   : > { %v3640_v23 = vpop.f32.mrb[35].mxu0 }
0x29ab   : > { %4814 = vmatprep.mubr.msk.f32.mxu0 %vm2718_vm7, %v3640_v23 }
0x29ac   : > { %4815 = vmatmul.mubr.msk.f32.vlgmr.msra.gmra.mrb[36].mxu0 %vm2718_vm7, %v4811_v21 }
0x29ad   : > { %4819 = vmatprep.mubr.msk.f32.mxu0 %vm2718_vm7, %v3562_v10  ;;  %4818 = vmatpush3.msra.mxu0 %v3736_v15 }
0x29ae   : > { %4822 = vmatprep.subr.msk.mxu0 %vm3850_vm0, %v3849_v24 }
0x29b0   : > { %4820 = vmatmul.mubr.msk.f32.vlgmr.msra.gmra.mrb[38].mxu0 %vm2718_vm7, %v3567_v25 }
0x29b1   : > { %4824 = vmatprep.mubr.msk.f32.mxu0 %vm459_vm5, %v5458_v30  ;;  %4823 = vmatpush3.msk.msra.mxu0 %vm3850_vm0, %v3849_v24  ;;  %v4322_v30 = vld [vmem:[%s5809_s1 + $0x168] ss:$0 sm:$0xff] }
0x29b2   : > { %4827 = vmatprep.subr.mxu0 %v3929_v12 }
0x29b4   : > { %4825 = vmatmul.mubr.msk.f32.vlgmr.msra.gmra.mrb[40].mxu0 %vm459_vm5, %v5454_v28 }
0x29b5   : > { %4828 = vmatpush3.msra.mxu0 %v3929_v12 }
0x29b6   : > { %4993 = vmatprep.subr.bf16.mxu0 %v5056_v3 }
0x2a7f   : > { %v4816_v27 = vpop.f32.mrb[36].mxu0 }
0x2a80   : > { %v3727_v32 = vpop.f32.mrb[37].mxu0  ;;  %v3733_v28 = vadd.f32 %v4816_v27, %v4319_v33  ;;  %v4037_v27 = vld [vmem:[%s5809_s1 + $0x180] sm:$0x1] }
0x2a81   : > { %v3728_v22 = vadd.f32 %v4319_v33, %v3727_v32 }
0x2a83   : > { %v4821_v41 = vpop.f32.mrb[38].mxu0 }
0x2a84   : > { %v3820_v14 = vadd.f32 %v4821_v41, %v4322_v30  ;;  %v3814_v34 = vpop.f32.mrb[39].mxu0 }
0x2a85   : > { %v3815_v35 = vadd.f32 %v4322_v30, %v3814_v34 }
0x2a86   : > { %v3824_v36 = vmax.f32 %v3733_v28, %v3820_v14 }
0x2a87   : > { %v3823_v37 = vmax.f32 %v3728_v22, %v3815_v35  ;;  %v4826_v38 = vpop.f32.mrb[40].mxu0 }
0x2a88   : > { %v3826_v3 = vsub.f32 %v3733_v28, %v3824_v36  ;;  %v3832_v43 = vsub.f32 %v3820_v14, %v3824_v36  ;;  %v4025_v29 = vsel %vm515_vm13, %v4826_v38, 0.0  ;;  %v3920_v44 = vpop.f32.mrb[41].mxu0  ;;  %vm4012_vm1 = vcmp.gt.f32.partialorder %v4826_v38, 0.5 }
0x2a89   : > { %v3825_v40 = vsub.f32 %v3728_v22, %v3823_v37  ;;  %v3831_v45 = vsub.f32 %v3815_v35, %v3823_v37  ;;  %v4024_v42 = vsel %vm515_vm13, %v3920_v44, 0.0  ;;  %vm4011_vm5 = vcmp.gt.f32.partialorder %v3920_v44, 0.5 }
0x2a8a   : > { %v3829_v47 = vmul.f32 1.442695, %v3826_v3  ;;  %v3835_v49 = vmul.f32 1.442695, %v3832_v43  ;;  %v4026_v50 = vadd.f32 %v4025_v29, %v4024_v42 }
0x2a8b   : > { %v3827_v51 = vmul.f32 1.442695, %v3825_v40  ;;  %v3833_v54 = vmul.f32 1.442695, %v3831_v45 }
0x2a8c   : > { %5036 = vpow2.f32 %v3829_v47  ;;  %v4027_v6 = vrot.slane %v4026_v50, 4 }
0x2a8d   : > { %5038 = vpow2.f32 %v3835_v49 }
0x2a8e   : > { %5040 = vpow2.f32 %v3827_v51  ;;  %v4028_v7 = vadd.f32 %v4027_v6, %v4026_v50 }
0x2a8f   : > { %5042 = vpow2.f32 %v3833_v54 }
0x2a90   : > { %v4029_v8 = vrot.slane %v4028_v7, 2 }
0x2a92   : > { %v4030_v15 = vadd.f32 %v4029_v8, %v4028_v7 }
0x2a94   : > { %v4031_v11 = vrot.slane %v4030_v15, 1 }
0x2a96   : > { %v5037_v39 = vpop.eup %5036 }
0x2a97   : > { %v5039_v55 = vpop.eup %5038  ;;  %v3838_v57 = vmul.f32 %v5037_v39, %v4811_v21 }
0x2a98   : > { %v5041_v58 = vpop.eup %5040  ;;  %v3840_v59 = vmul.f32 %v5039_v55, %v3567_v25  ;;  %v3844_v31 = vadd.f32 %v5039_v55, %v5037_v39 }
0x2a99   : > { %v5043_v18 = vpop.eup %5042  ;;  %v3837_v26 = vmul.f32 %v5041_v58, %v3640_v23 }
0x2a9a   : > { %5044 = vrcp.f32 %v3844_v31  ;;  %v3843_v48 = vadd.f32 %v5043_v18, %v5041_v58  ;;  %v3839_v60 = vmul.f32 %v5043_v18, %v3562_v10  ;;  %v3842_v61 = vadd.f32 %v3840_v59, %v3838_v57 }
0x2a9b   : > { %v4032_v10 = vadd.f32 %v4031_v11, %v4030_v15 }
0x2a9c   : > { %5046 = vrcp.f32 %v3843_v48  ;;  %v3841_v46 = vadd.f32 %v3839_v60, %v3837_v26 }
0x2aa4   : > { %v5045_v52 = vpop.eup %5044 }
0x2aa5   : > { %v3848_v62 = vmul.f32 %v5045_v52, %v3842_v61 }
0x2aa6   : > { %v5047_v63 = vpop.eup %5046 }
0x2aa7   : > { %v3847_v1 = vmul.f32 %v5047_v63, %v3841_v46  ;;  %4112 = vst.msk [vmem:[%s176_s17 + $0x8] sm:$0xff] %vm2718_vm7, %v3848_v62 }
0x2aa9   : > { %4829 = vmatprep.mubr.msk.f32.mxu0 %vm2718_vm7, %v3847_v1  ;;  %4111 = vst.msk [vmem:[%s176_s17] sm:$0xff] %vm2718_vm7, %v3847_v1 }
0x2aaa   : > { %4830 = vmatmul.mubr.msk.f32.vlgmr.msra.gmra.mrb[42].mxu0 %vm2718_vm7, %v3848_v62 }
0x2aab   : > { %4836 = vmatprep.mubr.msk.f32.mxu0 %vm5057_vm2, %v5058_v4  ;;  %4995 = vmatpush3.bf16.msra.mxu0 %v4994_v56  ;;  %vm4033_vm2 = vcmp.gt.f32.partialorder %v4032_v10, 0.5 }
0x2b7d   : > { %v4831_v53 = vpop.f32.mrb[42].mxu0 }
0x2b7e   : > { %v4014_v9 = vsel %vm4012_vm1, %v4831_v53, -1e+30  ;;  %v4002_v16 = vpop.f32.mrb[43].mxu0 }
0x2b7f   : > { %v4016_v4 = vsel %vm515_vm13, %v4014_v9, -inf  ;;  %v4013_v0 = vsel %vm4011_vm5, %v4002_v16, -1e+30 }
0x2b80   : > { %v4015_v17 = vsel %vm515_vm13, %v4013_v0, -inf }
0x2b81   : > { %v4017_v13 = vmax.f32 %v4015_v17, %v4016_v4 }
0x2b83   : > { %v4018_v19 = vrot.slane %v4017_v13, 4 }
0x2b85   : > { %v4019_v20 = vmax.f32 %v4017_v13, %v4018_v19 }
0x2b87   : > { %v4020_v21 = vrot.slane %v4019_v20, 2 }
0x2b89   : > { %v4021_v23 = vmax.f32 %v4019_v20, %v4020_v21 }
0x2b8b   : > { %v4022_v24 = vrot.slane %v4021_v23, 1 }
0x2b8d   : > { %v4023_v25 = vmax.f32 %v4021_v23, %v4022_v24 }
0x2b8f   : > { %v4034_v12 = vsel %vm4033_vm2, %v4023_v25, 0.0 }
0x2b90   : > { %4837 = vmatmul.mubr.msk.f32.vlgmr.msra.gmra.mrb[44].mxu0 %vm515_vm13, %v4034_v12 }
0x2c63   : > { %v4107_v32 = vpop.f32.mrb[44].mxu0 }
0x2c64   : > { %v4108_v33 = vadd.f32 %v4107_v32, %v4037_v27  ;;  %v4838_v30 = vpop.f32.mrb[45].mxu0 }
0x2c66   : > { %4114 = vst.msk [vmem:[%s179_s25] sm:$0x1] %vm4113_vm4, %v4108_v33 }
0x2c67 PF: > { %s14_s12 = sadd.s32 1, %s5054_s12  }
0x2c68   : > { %p11_p4 = scmp.ge.s32.totalorder %s14_s12, 4  }
0x2c6a   :  { %13 = sbr.rel (!%p11_p4) target bundleno = 1 (0x1), region = 70 }

</bundles_post_ra>
